<compile_context>
chip_gen: v6e
topology: v6e:2x2x1
jax: 0.10.0
libtpu: 0.0.40
codegen_flags: <defaults>
</compile_context>

<pallas_src>
import jax
import jax.numpy as jnp
from jax.experimental import pallas as pl
from jax.experimental.pallas import tpu as pltpu


def _gcn_fused_kernel(x_ref, at_ref, w_ref, b_ref, o_ref):
    """Fused GraphConvNet forward for one batch element.

    x_ref : [1, L, N, C]    bf16  activations (time, node, channel)
    at_ref: [S, N, N]       bf16  transposed supports A_s^T (resident across batch)
    w_ref : [K, C, Cout]    bf16  1x1-conv weight split per branch, K = order*S + 1
    b_ref : [1, Cout]       f32   bias
    o_ref : [1, L, N, Cout] f32   output
    """
    _, L, N, C = x_ref.shape
    S = at_ref.shape[0]
    K = w_ref.shape[0]
    order = (K - 1) // S
    Cout = o_ref.shape[3]

    x = x_ref[0]                                              # [L, N, C] bf16

    # Branch 0: identity branch (x @ W_0), accumulated in f32 on the MXU.
    acc = jnp.dot(x.reshape(L * N, C), w_ref[0],
                  preferred_element_type=jnp.float32)         # [L*N, Cout] f32

    k = 1
    for s in range(S):
        # Broadcast A_s^T once per support (hoisted, tiny, stays in VMEM/vregs).
        a_t = jnp.broadcast_to(at_ref[s], (L, N, N))          # [L, N, N] bf16
        h = x
        for _ in range(order):
            # node mixing: h[l] <- A_s^T @ h[l]   (== einsum('ncvl,vw->ncwl'))
            h32 = jnp.einsum('lnv,lvc->lnc', a_t, h,
                             preferred_element_type=jnp.float32)  # [L, N, C] f32
            h = h32.astype(jnp.bfloat16)
            # channel mixing of this branch, accumulated
            # (replaces the channel concat + one big 1x1 conv — no HBM concat).
            acc = acc + jnp.dot(h.reshape(L * N, C), w_ref[k],
                                preferred_element_type=jnp.float32)
            k += 1

    out = acc + b_ref[...]                                    # bias add (f32)
    # dropout: inference/eval semantics -> identity
    o_ref[0] = out.reshape(L, N, Cout)


def graph_conv_net(x, support, W, b, *, order=2):
    """GraphConvNet.forward (eval).

    x       : [B, C, N, L] float32  (PyTorch layout: batch, channel, node, time)
    support : sequence of S adjacency matrices [N, N]
    W       : [Cout, (order*S + 1) * C]  1x1-conv weight (kernel dims squeezed)
    b       : [Cout]
    returns : [B, Cout, N, L] float32
    """
    B, C, N, L = x.shape
    S = len(support)
    K = order * S + 1
    Cout = W.shape[0]
    assert W.shape[1] == K * C, (W.shape, K, C)

    # One-time layout / weight prep (weights reshaped once; one small input transpose).
    xT = jnp.transpose(x, (0, 3, 2, 1)).astype(jnp.bfloat16)                   # [B, L, N, C]
    at = jnp.stack([jnp.transpose(a) for a in support]).astype(jnp.bfloat16)   # [S, N, N]
    wk = jnp.transpose(W.reshape(Cout, K, C), (1, 2, 0)).astype(jnp.bfloat16)  # [K, C, Cout]
    bb = b.reshape(1, Cout).astype(jnp.float32)

    out = pl.pallas_call(
        _gcn_fused_kernel,
        grid=(B,),
        out_shape=jax.ShapeDtypeStruct((B, L, N, Cout), jnp.float32),
        in_specs=[
            pl.BlockSpec((1, L, N, C), lambda bi: (bi, 0, 0, 0)),
            pl.BlockSpec((S, N, N), lambda bi: (0, 0, 0)),     # resident across batch
            pl.BlockSpec((K, C, Cout), lambda bi: (0, 0, 0)),  # resident across batch
            pl.BlockSpec((1, Cout), lambda bi: (0, 0)),        # resident across batch
        ],
        out_specs=pl.BlockSpec((1, L, N, Cout), lambda bi: (bi, 0, 0, 0)),
        compiler_params=pltpu.CompilerParams(
            dimension_semantics=("parallel",)),  # batch shards across TCs on v7x
    )(xT, at, wk, bb)

    # back to the PyTorch output layout [B, Cout, N, L]
    return jnp.transpose(out, (0, 3, 2, 1))


def graph_conv_net_ref(x, support, W, b, *, order=2):
    """Pure-JAX f32 reference matching the PyTorch module (eval mode)."""
    outs = [x]
    for a in support:
        x1 = jnp.einsum('ncvl,vw->ncwl', x, a)
        outs.append(x1)
        for _ in range(2, order + 1):
            x1 = jnp.einsum('ncvl,vw->ncwl', x1, a)
            outs.append(x1)
    h = jnp.concatenate(outs, axis=1)                           # [B, K*C, N, L]
    return jnp.einsum('ok,bknl->bonl', W, h) + b[None, :, None, None]


if __name__ == "__main__":
    key = jax.random.PRNGKey(0)
    k_x, k_a1, k_a2, k_w, k_b = jax.random.split(key, 5)

    # Small shapes consistent with the ASU usage of GraphConvNet:
    # batch=2, channels(hidden)=32, nodes(stocks)=8, time=16; support_len=2, order=2.
    B, C, N, L = 2, 32, 8, 16
    order, Cout, S = 2, 32, 2
    K = order * S + 1

    x = jax.random.normal(k_x, (B, C, N, L), jnp.float32)
    # column-stochastic supports (softmax over the contracted node axis, like ASU's adaptive adj)
    a1 = jax.nn.softmax(jnp.maximum(jax.random.normal(k_a1, (N, N)), 0.0), axis=0)
    a2 = jax.nn.softmax(jnp.maximum(jax.random.normal(k_a2, (N, N)), 0.0), axis=0)
    support = [a1, a2]
    W = 0.1 * jax.random.normal(k_w, (Cout, K * C), jnp.float32)
    b = 0.1 * jax.random.normal(k_b, (Cout,), jnp.float32)

    fwd = jax.jit(lambda x_, sup_, W_, b_: graph_conv_net(x_, sup_, W_, b_, order=2))
    out = jax.block_until_ready(fwd(x, support, W, b))
    assert out.shape == (B, Cout, N, L), out.shape
    assert out.dtype == jnp.float32

    # sanity check against the pure-f32 reference (bf16 MXU tolerance)
    ref = graph_conv_net_ref(x, support, W, b, order=2)
    err = float(jnp.max(jnp.abs(out - ref)))
    assert err < 0.2, f"max abs err vs f32 reference too large: {err}"

    print("KERNEL_OK")
</pallas_src>

<mosaic_0001>
module attributes {stable_mosaic.version = 11 : i64} {
  func.func @_gcn_fused_kernel(%arg0: i32, %arg1: memref<1x16x8x32xbf16, #tpu.memory_space<vmem>>, %arg2: memref<2x8x8xbf16, #tpu.memory_space<vmem>>, %arg3: memref<5x32x32xbf16, #tpu.memory_space<vmem>>, %arg4: memref<1x32xf32, #tpu.memory_space<vmem>>, %arg5: memref<1x16x8x32xf32, #tpu.memory_space<vmem>>) attributes {dimension_semantics = [#tpu.dimension_semantics<parallel>], iteration_bounds = array<i64: 2>, scalar_prefetch = 0 : i64, scratch_operands = 0 : i64, tpu.core_type = #tpu.core_type<tc>, window_params = [{transform_indices = @transform_0, window_bounds = array<i64: 1, 16, 8, 32>}, {pipeline_mode = #tpu.pipeline_mode<synchronous>, transform_indices = @transform_1, window_bounds = array<i64: 2, 8, 8>}, {pipeline_mode = #tpu.pipeline_mode<synchronous>, transform_indices = @transform_2, window_bounds = array<i64: 5, 32, 32>}, {pipeline_mode = #tpu.pipeline_mode<synchronous>, transform_indices = @transform_3, window_bounds = array<i64: 1, 32>}, {transform_indices = @transform_4, window_bounds = array<i64: 1, 16, 8, 32>}]} {
    %c0 = arith.constant 0 : index
    %c0_0 = arith.constant 0 : index
    %c0_1 = arith.constant 0 : index
    %c0_2 = arith.constant 0 : index
    %0 = vector.load %arg1[%c0, %c0_0, %c0_1, %c0_2] : memref<1x16x8x32xbf16, #tpu.memory_space<vmem>>, vector<1x16x8x32xbf16>
    %1 = vector.shape_cast %0 : vector<1x16x8x32xbf16> to vector<16x8x32xbf16>
    %2 = vector.shape_cast %1 : vector<16x8x32xbf16> to vector<128x32xbf16>
    %c0_3 = arith.constant 0 : index
    %c0_4 = arith.constant 0 : index
    %c0_5 = arith.constant 0 : index
    %3 = vector.load %arg3[%c0_3, %c0_4, %c0_5] : memref<5x32x32xbf16, #tpu.memory_space<vmem>>, vector<1x32x32xbf16>
    %4 = vector.shape_cast %3 : vector<1x32x32xbf16> to vector<32x32xbf16>
    %cst = arith.constant dense<0.000000e+00> : vector<128x32xf32>
    %5 = tpu.matmul %2, %4, %cst {dimension_numbers = #tpu.dot_dimension_numbers<[1], [0], [0], [1], [0, 0, 1, 1], [], []>} : vector<128x32xbf16>, vector<32x32xbf16>, vector<128x32xf32> -> vector<128x32xf32>
    %c0_6 = arith.constant 0 : index
    %c0_7 = arith.constant 0 : index
    %c0_8 = arith.constant 0 : index
    %6 = vector.load %arg2[%c0_6, %c0_7, %c0_8] : memref<2x8x8xbf16, #tpu.memory_space<vmem>>, vector<1x8x8xbf16>
    %7 = vector.shape_cast %6 : vector<1x8x8xbf16> to vector<8x8xbf16>
    %8 = vector.shape_cast %7 : vector<8x8xbf16> to vector<1x8x8xbf16>
    %9 = vector.broadcast %8 : vector<1x8x8xbf16> to vector<16x8x8xbf16>
    "tpu.trace_start"() <{level = 10 : i32, message = "lnv,lvc->lnc"}> : () -> ()
    %cst_9 = arith.constant dense<0.000000e+00> : vector<16x8x32xf32>
    %10 = tpu.matmul %9, %1, %cst_9 {dimension_numbers = #tpu.dot_dimension_numbers<[2], [1], [1], [2], [0, 0, 0, 1, 1, 2], [0], [0]>} : vector<16x8x8xbf16>, vector<16x8x32xbf16>, vector<16x8x32xf32> -> vector<16x8x32xf32>
    "tpu.trace_stop"() : () -> ()
    %11 = arith.truncf %10 : vector<16x8x32xf32> to vector<16x8x32xbf16>
    %12 = vector.shape_cast %11 : vector<16x8x32xbf16> to vector<128x32xbf16>
    %c1 = arith.constant 1 : index
    %c0_10 = arith.constant 0 : index
    %c0_11 = arith.constant 0 : index
    %13 = vector.load %arg3[%c1, %c0_10, %c0_11] : memref<5x32x32xbf16, #tpu.memory_space<vmem>>, vector<1x32x32xbf16>
    %14 = vector.shape_cast %13 : vector<1x32x32xbf16> to vector<32x32xbf16>
    %cst_12 = arith.constant dense<0.000000e+00> : vector<128x32xf32>
    %15 = tpu.matmul %12, %14, %cst_12 {dimension_numbers = #tpu.dot_dimension_numbers<[1], [0], [0], [1], [0, 0, 1, 1], [], []>} : vector<128x32xbf16>, vector<32x32xbf16>, vector<128x32xf32> -> vector<128x32xf32>
    %16 = arith.addf %5, %15 : vector<128x32xf32>
    "tpu.trace_start"() <{level = 10 : i32, message = "lnv,lvc->lnc"}> : () -> ()
    %cst_13 = arith.constant dense<0.000000e+00> : vector<16x8x32xf32>
    %17 = tpu.matmul %9, %11, %cst_13 {dimension_numbers = #tpu.dot_dimension_numbers<[2], [1], [1], [2], [0, 0, 0, 1, 1, 2], [0], [0]>} : vector<16x8x8xbf16>, vector<16x8x32xbf16>, vector<16x8x32xf32> -> vector<16x8x32xf32>
    "tpu.trace_stop"() : () -> ()
    %18 = arith.truncf %17 : vector<16x8x32xf32> to vector<16x8x32xbf16>
    %19 = vector.shape_cast %18 : vector<16x8x32xbf16> to vector<128x32xbf16>
    %c2 = arith.constant 2 : index
    %c0_14 = arith.constant 0 : index
    %c0_15 = arith.constant 0 : index
    %20 = vector.load %arg3[%c2, %c0_14, %c0_15] : memref<5x32x32xbf16, #tpu.memory_space<vmem>>, vector<1x32x32xbf16>
    %21 = vector.shape_cast %20 : vector<1x32x32xbf16> to vector<32x32xbf16>
    %cst_16 = arith.constant dense<0.000000e+00> : vector<128x32xf32>
    %22 = tpu.matmul %19, %21, %cst_16 {dimension_numbers = #tpu.dot_dimension_numbers<[1], [0], [0], [1], [0, 0, 1, 1], [], []>} : vector<128x32xbf16>, vector<32x32xbf16>, vector<128x32xf32> -> vector<128x32xf32>
    %23 = arith.addf %16, %22 : vector<128x32xf32>
    %c1_17 = arith.constant 1 : index
    %c0_18 = arith.constant 0 : index
    %c0_19 = arith.constant 0 : index
    %24 = vector.load %arg2[%c1_17, %c0_18, %c0_19] : memref<2x8x8xbf16, #tpu.memory_space<vmem>>, vector<1x8x8xbf16>
    %25 = vector.shape_cast %24 : vector<1x8x8xbf16> to vector<8x8xbf16>
    %26 = vector.shape_cast %25 : vector<8x8xbf16> to vector<1x8x8xbf16>
    %27 = vector.broadcast %26 : vector<1x8x8xbf16> to vector<16x8x8xbf16>
    "tpu.trace_start"() <{level = 10 : i32, message = "lnv,lvc->lnc"}> : () -> ()
    %cst_20 = arith.constant dense<0.000000e+00> : vector<16x8x32xf32>
    %28 = tpu.matmul %27, %1, %cst_20 {dimension_numbers = #tpu.dot_dimension_numbers<[2], [1], [1], [2], [0, 0, 0, 1, 1, 2], [0], [0]>} : vector<16x8x8xbf16>, vector<16x8x32xbf16>, vector<16x8x32xf32> -> vector<16x8x32xf32>
    "tpu.trace_stop"() : () -> ()
    %29 = arith.truncf %28 : vector<16x8x32xf32> to vector<16x8x32xbf16>
    %30 = vector.shape_cast %29 : vector<16x8x32xbf16> to vector<128x32xbf16>
    %c3 = arith.constant 3 : index
    %c0_21 = arith.constant 0 : index
    %c0_22 = arith.constant 0 : index
    %31 = vector.load %arg3[%c3, %c0_21, %c0_22] : memref<5x32x32xbf16, #tpu.memory_space<vmem>>, vector<1x32x32xbf16>
    %32 = vector.shape_cast %31 : vector<1x32x32xbf16> to vector<32x32xbf16>
    %cst_23 = arith.constant dense<0.000000e+00> : vector<128x32xf32>
    %33 = tpu.matmul %30, %32, %cst_23 {dimension_numbers = #tpu.dot_dimension_numbers<[1], [0], [0], [1], [0, 0, 1, 1], [], []>} : vector<128x32xbf16>, vector<32x32xbf16>, vector<128x32xf32> -> vector<128x32xf32>
    %34 = arith.addf %23, %33 : vector<128x32xf32>
    "tpu.trace_start"() <{level = 10 : i32, message = "lnv,lvc->lnc"}> : () -> ()
    %cst_24 = arith.constant dense<0.000000e+00> : vector<16x8x32xf32>
    %35 = tpu.matmul %27, %29, %cst_24 {dimension_numbers = #tpu.dot_dimension_numbers<[2], [1], [1], [2], [0, 0, 0, 1, 1, 2], [0], [0]>} : vector<16x8x8xbf16>, vector<16x8x32xbf16>, vector<16x8x32xf32> -> vector<16x8x32xf32>
    "tpu.trace_stop"() : () -> ()
    %36 = arith.truncf %35 : vector<16x8x32xf32> to vector<16x8x32xbf16>
    %37 = vector.shape_cast %36 : vector<16x8x32xbf16> to vector<128x32xbf16>
    %c4 = arith.constant 4 : index
    %c0_25 = arith.constant 0 : index
    %c0_26 = arith.constant 0 : index
    %38 = vector.load %arg3[%c4, %c0_25, %c0_26] : memref<5x32x32xbf16, #tpu.memory_space<vmem>>, vector<1x32x32xbf16>
    %39 = vector.shape_cast %38 : vector<1x32x32xbf16> to vector<32x32xbf16>
    %cst_27 = arith.constant dense<0.000000e+00> : vector<128x32xf32>
    %40 = tpu.matmul %37, %39, %cst_27 {dimension_numbers = #tpu.dot_dimension_numbers<[1], [0], [0], [1], [0, 0, 1, 1], [], []>} : vector<128x32xbf16>, vector<32x32xbf16>, vector<128x32xf32> -> vector<128x32xf32>
    %41 = arith.addf %34, %40 : vector<128x32xf32>
    %c0_28 = arith.constant 0 : index
    %c0_29 = arith.constant 0 : index
    %42 = vector.load %arg4[%c0_28, %c0_29] : memref<1x32xf32, #tpu.memory_space<vmem>>, vector<1x32xf32>
    %43 = vector.broadcast %42 : vector<1x32xf32> to vector<128x32xf32>
    %44 = arith.addf %41, %43 : vector<128x32xf32>
    %45 = vector.shape_cast %44 : vector<128x32xf32> to vector<16x8x32xf32>
    %c0_30 = arith.constant 0 : index
    %c0_31 = arith.constant 0 : index
    %c0_32 = arith.constant 0 : index
    %c0_33 = arith.constant 0 : index
    %46 = vector.load %arg5[%c0_30, %c0_31, %c0_32, %c0_33] : memref<1x16x8x32xf32, #tpu.memory_space<vmem>>, vector<1x16x8x32xf32>
    %47 = vector.shape_cast %46 : vector<1x16x8x32xf32> to vector<16x8x32xf32>
    %48 = vector.shape_cast %45 : vector<16x8x32xf32> to vector<1x16x8x32xf32>
    tpu.vector_store %arg5[%c0_30, %c0_31, %c0_32, %c0_33], %48 {strides = array<i32>} : memref<1x16x8x32xf32, #tpu.memory_space<vmem>>, vector<1x16x8x32xf32>,
    return
  }
  func.func @transform_0(%arg0: i32) -> (i32, i32, i32, i32) {
    %c0_i32 = arith.constant 0 : i32
    %c0_i32_0 = arith.constant 0 : i32
    %c0_i32_1 = arith.constant 0 : i32
    %c0_i32_2 = arith.constant 0 : i32
    return %arg0, %c0_i32, %c0_i32_0, %c0_i32_1 : i32, i32, i32, i32
  }
  func.func @transform_1(%arg0: i32) -> (i32, i32, i32) {
    %c0_i32 = arith.constant 0 : i32
    %c0_i32_0 = arith.constant 0 : i32
    %c0_i32_1 = arith.constant 0 : i32
    %c0_i32_2 = arith.constant 0 : i32
    return %c0_i32, %c0_i32_0, %c0_i32_1 : i32, i32, i32
  }
  func.func @transform_2(%arg0: i32) -> (i32, i32, i32) {
    %c0_i32 = arith.constant 0 : i32
    %c0_i32_0 = arith.constant 0 : i32
    %c0_i32_1 = arith.constant 0 : i32
    %c0_i32_2 = arith.constant 0 : i32
    return %c0_i32, %c0_i32_0, %c0_i32_1 : i32, i32, i32
  }
  func.func @transform_3(%arg0: i32) -> (i32, i32) {
    %c0_i32 = arith.constant 0 : i32
    %c0_i32_0 = arith.constant 0 : i32
    %c0_i32_1 = arith.constant 0 : i32
    return %c0_i32, %c0_i32_0 : i32, i32
  }
  func.func @transform_4(%arg0: i32) -> (i32, i32, i32, i32) {
    %c0_i32 = arith.constant 0 : i32
    %c0_i32_0 = arith.constant 0 : i32
    %c0_i32_1 = arith.constant 0 : i32
    %c0_i32_2 = arith.constant 0 : i32
    return %arg0, %c0_i32, %c0_i32_0, %c0_i32_1 : i32, i32, i32, i32
  }
}

</mosaic_0001>

<bundles_post_ra>
// kernel: _lambda_.1
= control target key start
LH: loop header
LB: loop body
LE: loop exit
PB: predicated region body
PF: predicated region fallthrough
CT: control target
= control target key end

     0   :  { %s4972_s15 = smov 0   ;;  %s5949_s0 = inlined_call_operand.vmem [shape: bf16[2,16,8,32], index: 0, kind: input, shape index: {}]   ;;  %s5950_s1 = inlined_call_operand.vmem [shape: bf16[2,8,8], index: 1, kind: input, shape index: {}]   ;;  %s5951_s2 = inlined_call_operand.vmem [shape: bf16[5,32,32], index: 2, kind: input, shape index: {}]   ;;  %s5952_s3 = inlined_call_operand.vmem [shape: f32[1,32], index: 3, kind: input, shape index: {}]   ;;  %s5953_s4 = inlined_call_operand.vmem [shape: f32[2,16,8,32], index: 4, kind: output, shape index: {}]  }
   0x1 LB: > { %s4026_s16 = sadd.s32 4294967295, %s4943_s15   ;;  %p4030_p0 = scmp.ge.s32.totalorder %s4943_s15, 1  ;;  %s4943_s15 = sphi %s4972_s15, %s14_s15  }
   0x2   : > { %p162_p1 = scmp.lt.s32.totalorder %s4943_s15, 3 }
   0x4   : > { %p163_p2 = pnand %p4030_p0, %p162_p1 }
   0x5   : > { %p188_p3 = scmp.lt.s32.totalorder (!%p163_p2), %s4026_s16, 1 }
   0x6   : > { %166 = sbr.rel (%p163_p2) target bundleno = 1251 (0x4e3), region = 36 }
   0xb   : > { %v4945_v0 = vmov 0.0   ;;  %s5955_s16 = smov (!%p188_p3, %s4026_s16), 1  ;;  %vm4946_vm0 = vmmov 0   ;;  %vm224_vm1 = vcmask 1043456   ;;  %v5016_v7 = vld [vmem:[%s5950_s1] sm:$0xf] }
   0xc   : > { %4421 = vmatprep.subr.bf16.mxu0 %v4945_v0  ;;  %4427 = vmatprep.subr.bf16.mxu1 %v4945_v0  ;;  %s4209_s17 = sshll.u32 %s5955_s16, 6  ;;  %vm220_vm2 = vcmask 64512   ;;  %v4927_v42 = vld [vmem:[%s5951_s2 + $0x18] sm:$0xff]   ;;  %v4928_v43 = vld [vmem:[%s5951_s2 + $0x10] sm:$0xff]   ;;  %v5227_v44 = vld [vmem:[%s5951_s2 + $0x8] sm:$0xff]   ;;  %vm986_vm3 = vcmask 261120  }
   0xd   : > { %4423 = vmatprep.mubr.msk.bf16.mxu0 %vm4946_vm0, %v4945_v0  ;;  %4429 = vmatprep.mubr.msk.bf16.mxu1 %vm4946_vm0, %v4945_v0  ;;  %s4992_s20 = scalar_lea.vmem %s5949_s0, %s4209_s17  ;;  %s4210_s21 = sshll.u32 %s5955_s16, 7 }
   0xe   : > { %v4995_v1 = vld [vmem:[%s4992_s20] sm:$0xf]  ;;  %v4998_v2 = vld [vmem:[%s4992_s20 + $0x4] sm:$0xf]  ;;  %v5001_v3 = vld [vmem:[%s4992_s20 + $0x8] sm:$0xf]  ;;  %s5880_s26 = scalar_lea.vmem %s5953_s4, %s4210_s21 }
   0xf   : > { %v5005_v4 = vsel %vm224_vm1, %v4995_v1, 0  ;;  %v5009_v5 = vsel %vm224_vm1, %v4998_v2, 0  ;;  %v4073_v6 = vcombine.low %v4995_v1, %v4998_v2  ;;  %v5019_v8 = vld [vmem:[%s4992_s20 + $0xc] sm:$0xf]  ;;  %v5026_v10 = vld [vmem:[%s4992_s20 + $0x10] sm:$0xf] }
  0x10   : > { %4422 = vmatpush3.bf16.msra.mxu0 %v5005_v4  ;;  %4428 = vmatpush3.bf16.msra.mxu1 %v5009_v5  ;;  %v4074_v9 = vcombine.low %v5001_v3, %v5019_v8  ;;  %v5029_v11 = vld [vmem:[%s4992_s20 + $0x14] sm:$0xf]  ;;  %v5035_v12 = vsel %vm224_vm1, %v5001_v3, 0  ;;  %v5039_v13 = vsel %vm224_vm1, %v5019_v8, 0  ;;  %v5044_v15 = vld [vmem:[%s4992_s20 + $0x18] sm:$0xf] }
  0x11   : > { %4433 = vmatprep.subr.bf16.mxu0 %v4945_v0  ;;  %4439 = vmatprep.subr.bf16.mxu1 %v4945_v0  ;;  %v4075_v14 = vcombine.low %v5026_v10, %v5029_v11  ;;  %v5047_v16 = vld [vmem:[%s4992_s20 + $0x1c] sm:$0xf]  ;;  %v5052_v18 = vld [vmem:[%s4992_s20 + $0x20] sm:$0xf]  ;;  %v5055_v19 = vld [vmem:[%s4992_s20 + $0x24] sm:$0xf] }
  0x12   : > { %v4076_v17 = vcombine.low %v5044_v15, %v5047_v16  ;;  %v4077_v20 = vcombine.low %v5052_v18, %v5055_v19  ;;  %v5064_v21 = vld [vmem:[%s4992_s20 + $0x28] sm:$0xf]  ;;  %v5067_v22 = vld [vmem:[%s4992_s20 + $0x2c] sm:$0xf]  ;;  %v5074_v24 = vld [vmem:[%s4992_s20 + $0x30] sm:$0xf] }
  0x13   : > { %4424 = vmatmul.mubr.msk.bf16.vlgmr.msra.gmra.mxu0 %vm220_vm2, %v5016_v7  ;;  %4430 = vmatmul.mubr.msk.bf16.vlgmr.msra.gmra.mxu1 %vm220_vm2, %v5016_v7  ;;  %v4078_v23 = vcombine.low %v5064_v21, %v5067_v22  ;;  %v5077_v25 = vld [vmem:[%s4992_s20 + $0x34] sm:$0xf]  ;;  %v5086_v27 = vld [vmem:[%s4992_s20 + $0x38] sm:$0xf]  ;;  %v5089_v28 = vld [vmem:[%s4992_s20 + $0x3c] sm:$0xf] }
  0x14   : > { %4434 = vmatpush3.bf16.msra.mxu0 %v5035_v12  ;;  %4440 = vmatpush3.bf16.msra.mxu1 %v5039_v13  ;;  %v4079_v26 = vcombine.low %v5074_v24, %v5077_v25  ;;  %v4080_v29 = vcombine.low %v5086_v27, %v5089_v28  ;;  %v5097_v30 = vsel %vm224_vm1, %v5026_v10, 0  ;;  %v5101_v31 = vsel %vm224_vm1, %v5029_v11, 0 }
  0x15   : > { %4435 = vmatprep.mubr.msk.bf16.mxu0 %vm4946_vm0, %v4945_v0  ;;  %4441 = vmatprep.mubr.msk.bf16.mxu1 %vm4946_vm0, %v4945_v0  ;;  %v5117_v32 = vsel %vm224_vm1, %v5044_v15, 0  ;;  %v5121_v33 = vsel %vm224_vm1, %v5047_v16, 0  ;;  %v5137_v34 = vsel %vm224_vm1, %v5052_v18, 0  ;;  %v5141_v35 = vsel %vm224_vm1, %v5055_v19, 0 }
  0x16   : > { %4445 = vmatprep.subr.bf16.mxu0 %v4945_v0  ;;  %4451 = vmatprep.subr.bf16.mxu1 %v4945_v0  ;;  %v5157_v36 = vsel %vm224_vm1, %v5064_v21, 0  ;;  %v5161_v37 = vsel %vm224_vm1, %v5067_v22, 0  ;;  %v5177_v38 = vsel %vm224_vm1, %v5074_v24, 0  ;;  %v5181_v39 = vsel %vm224_vm1, %v5077_v25, 0 }
  0x17   : > { %v5197_v40 = vsel %vm224_vm1, %v5086_v27, 0  ;;  %v5201_v41 = vsel %vm224_vm1, %v5089_v28, 0 }
  0x1b   : > { %4436 = vmatmul.mubr.msk.bf16.vlgmr.msra.gmra.mxu0 %vm220_vm2, %v5016_v7  ;;  %4442 = vmatmul.mubr.msk.bf16.vlgmr.msra.gmra.mxu1 %vm220_vm2, %v5016_v7 }
  0x1c   : > { %4446 = vmatpush3.bf16.msra.mxu0 %v5097_v30  ;;  %4452 = vmatpush3.bf16.msra.mxu1 %v5101_v31 }
  0x1d   : > { %4447 = vmatprep.mubr.msk.bf16.mxu0 %vm4946_vm0, %v4945_v0  ;;  %4453 = vmatprep.mubr.msk.bf16.mxu1 %vm4946_vm0, %v4945_v0 }
  0x1e   : > { %4457 = vmatprep.subr.bf16.mxu0 %v4945_v0  ;;  %4463 = vmatprep.subr.bf16.mxu1 %v4945_v0 }
  0x23   : > { %4448 = vmatmul.mubr.msk.bf16.vlgmr.msra.gmra.mxu0 %vm220_vm2, %v5016_v7  ;;  %4454 = vmatmul.mubr.msk.bf16.vlgmr.msra.gmra.mxu1 %vm220_vm2, %v5016_v7 }
  0x24   : > { %4458 = vmatpush3.bf16.msra.mxu0 %v5117_v32  ;;  %4464 = vmatpush3.bf16.msra.mxu1 %v5121_v33 }
  0x25   : > { %4459 = vmatprep.mubr.msk.bf16.mxu0 %vm4946_vm0, %v4945_v0  ;;  %4465 = vmatprep.mubr.msk.bf16.mxu1 %vm4946_vm0, %v4945_v0 }
  0x26   : > { %4469 = vmatprep.subr.bf16.mxu0 %v4945_v0  ;;  %4475 = vmatprep.subr.bf16.mxu1 %v4945_v0 }
  0x2b   : > { %4460 = vmatmul.mubr.msk.bf16.vlgmr.msra.gmra.mxu0 %vm220_vm2, %v5016_v7  ;;  %4466 = vmatmul.mubr.msk.bf16.vlgmr.msra.gmra.mxu1 %vm220_vm2, %v5016_v7 }
  0x2c   : > { %4470 = vmatpush3.bf16.msra.mxu0 %v5137_v34  ;;  %4476 = vmatpush3.bf16.msra.mxu1 %v5141_v35 }
  0x2d   : > { %4471 = vmatprep.mubr.msk.bf16.mxu0 %vm4946_vm0, %v4945_v0  ;;  %4477 = vmatprep.mubr.msk.bf16.mxu1 %vm4946_vm0, %v4945_v0 }
  0x2e   : > { %4481 = vmatprep.subr.bf16.mxu0 %v4945_v0  ;;  %4487 = vmatprep.subr.bf16.mxu1 %v4945_v0 }
  0x33   : > { %4472 = vmatmul.mubr.msk.bf16.vlgmr.msra.gmra.mxu0 %vm220_vm2, %v5016_v7  ;;  %4478 = vmatmul.mubr.msk.bf16.vlgmr.msra.gmra.mxu1 %vm220_vm2, %v5016_v7 }
  0x34   : > { %4482 = vmatpush3.bf16.msra.mxu0 %v5157_v36  ;;  %4488 = vmatpush3.bf16.msra.mxu1 %v5161_v37 }
  0x35   : > { %4483 = vmatprep.mubr.msk.bf16.mxu0 %vm4946_vm0, %v4945_v0  ;;  %4489 = vmatprep.mubr.msk.bf16.mxu1 %vm4946_vm0, %v4945_v0 }
  0x36   : > { %4493 = vmatprep.subr.bf16.mxu0 %v4945_v0  ;;  %4499 = vmatprep.subr.bf16.mxu1 %v4945_v0 }
  0x3b   : > { %4484 = vmatmul.mubr.msk.bf16.vlgmr.msra.gmra.mxu0 %vm220_vm2, %v5016_v7  ;;  %4490 = vmatmul.mubr.msk.bf16.vlgmr.msra.gmra.mxu1 %vm220_vm2, %v5016_v7 }
  0x3c   : > { %4494 = vmatpush3.bf16.msra.mxu0 %v5177_v38  ;;  %4500 = vmatpush3.bf16.msra.mxu1 %v5181_v39 }
  0x3d   : > { %4495 = vmatprep.mubr.msk.bf16.mxu0 %vm4946_vm0, %v4945_v0  ;;  %4501 = vmatprep.mubr.msk.bf16.mxu1 %vm4946_vm0, %v4945_v0 }
  0x3e   : > { %4505 = vmatprep.subr.bf16.mxu0 %v4945_v0  ;;  %4511 = vmatprep.subr.bf16.mxu1 %v4945_v0 }
  0x43   : > { %4496 = vmatmul.mubr.msk.bf16.vlgmr.msra.gmra.mxu0 %vm220_vm2, %v5016_v7  ;;  %4502 = vmatmul.mubr.msk.bf16.vlgmr.msra.gmra.mxu1 %vm220_vm2, %v5016_v7 }
  0x44   : > { %4506 = vmatpush3.bf16.msra.mxu0 %v5197_v40  ;;  %4512 = vmatpush3.bf16.msra.mxu1 %v5201_v41 }
  0x45   : > { %4507 = vmatprep.mubr.msk.bf16.mxu0 %vm4946_vm0, %v4945_v0  ;;  %4513 = vmatprep.mubr.msk.bf16.mxu1 %vm4946_vm0, %v4945_v0 }
  0x46   : > { %4517 = vmatprep.subr.bf16.mxu0 %v4927_v42  ;;  %4905 = vmatprep.subr.bf16.mxu1 %v4927_v42 }
  0x4b   : > { %4508 = vmatmul.mubr.msk.bf16.vlgmr.msra.gmra.mxu0 %vm220_vm2, %v5016_v7  ;;  %4514 = vmatmul.mubr.msk.bf16.vlgmr.msra.gmra.mxu1 %vm220_vm2, %v5016_v7 }
  0x4c   : > { %4518 = vmatpush3.bf16.msra.mxu0 %v4927_v42  ;;  %4907 = vmatpush3.bf16.msra.mxu1 %v4927_v42 }
  0x4d   : > { %4519 = vmatprep.subr.bf16.mxu0 %v4928_v43  ;;  %4906 = vmatprep.subr.bf16.mxu1 %v4928_v43 }
  0x50   : > { %4520 = vmatpush3.bf16.msra.mxu0 %v4928_v43  ;;  %4908 = vmatpush3.bf16.msra.mxu1 %v4928_v43 }
  0x51   : > { %4557 = vmatprep.subr.bf16.mxu0 %v4945_v0  ;;  %4537 = vmatprep.subr.bf16.mxu1 %v5227_v44 }
  0xd3   : > { %v262_v45 = vpop.f32.mrf.mxu0  ;;  %v5230_v46 = vpop.f32.mrf.mxu1 }
  0xd4   : > { %v4211_v47 = vpack.c.bf16 %v5230_v46, %v262_v45  ;;  %v913_v54 = vpack.c.bf16 %v262_v45, %v262_v45 }
  0xd5   : > { %v4425_v48 = vpop.f32.mrf.mxu0  ;;  %v4431_v49 = vpop.f32.mrf.mxu1 }
  0xd6   : > { %4521 = vmatprep.mubr.msk.bf16.mxu0 %vm986_vm3, %v4211_v47  ;;  %v1282_v60 = vsel %vm224_vm1, %v913_v54, 0 }
  0xd7   : > { %v265_v50 = vpop.f32.mrf.mxu0  ;;  %v308_v51 = vpop.f32.mrf.mxu1 }
  0xd9   : > { %v4426_v52 = vpop.f32.mrf.mxu0  ;;  %v4432_v53 = vpop.f32.mrf.mxu1 }
  0xdb   : > { %v348_v55 = vpop.f32.mrf.mxu0  ;;  %v5234_v56 = vpop.f32.mrf.mxu1 }
  0xdc   : > { %v4212_v57 = vpack.c.bf16 %v5234_v56, %v348_v55  ;;  %v916_v10 = vpack.c.bf16 %v5234_v56, %v5234_v56 }
  0xdd   : > { %v4437_v58 = vpop.f32.mrf.mxu0  ;;  %v4443_v59 = vpop.f32.mrf.mxu1 }
  0xde   : > { %4522 = vmatmul.mubr.msk.bf16.vlgmr.msra.gmra.mxu0 %vm986_vm3, %v4212_v57  ;;  %v1411_v11 = vsel %vm224_vm1, %v916_v10, 0 }
  0xdf   : > { %4558 = vmatpush3.bf16.msra.mxu0 %v1282_v60  ;;  %v351_v61 = vpop.f32.mrf.mxu0  ;;  %v394_v62 = vpop.f32.mrf.mxu1 }
  0xe0   : > { %4569 = vmatprep.subr.bf16.mxu0 %v4945_v0 }
  0xe1   : > { %v4438_v63 = vpop.f32.mrf.mxu0  ;;  %v4444_v42 = vpop.f32.mrf.mxu1 }
  0xe3   : > { %v434_v43 = vpop.f32.mrf.mxu0  ;;  %v5240_v45 = vpop.f32.mrf.mxu1 }
  0xe4   : > { %v4213_v47 = vpack.c.bf16 %v5240_v45, %v434_v43 }
  0xe5   : > { %v4449_v48 = vpop.f32.mrf.mxu0  ;;  %v4455_v49 = vpop.f32.mrf.mxu1 }
  0xe6   : > { %4525 = vmatprep.mubr.msk.bf16.mxu0 %vm986_vm3, %v4213_v47  ;;  %v915_v47 = vpack.c.bf16 %v348_v55, %v348_v55 }
  0xe7   : > { %v437_v50 = vpop.f32.mrf.mxu0  ;;  %v480_v51 = vpop.f32.mrf.mxu1 }
  0xe9   : > { %v4450_v52 = vpop.f32.mrf.mxu0  ;;  %v4456_v53 = vpop.f32.mrf.mxu1 }
  0xea   : > { %v1368_v53 = vsel %vm224_vm1, %v915_v47, 0 }
  0xeb   : > { %v520_v54 = vpop.f32.mrf.mxu0  ;;  %v5244_v57 = vpop.f32.mrf.mxu1 }
  0xec   : > { %v4214_v58 = vpack.c.bf16 %v5244_v57, %v520_v54  ;;  %v920_v16 = vpack.c.bf16 %v5244_v57, %v5244_v57 }
  0xed   : > { %v4461_v59 = vpop.f32.mrf.mxu0  ;;  %v4467_v60 = vpop.f32.mrf.mxu1 }
  0xee   : > { %4526 = vmatmul.mubr.msk.bf16.gmra.mxu0 %vm986_vm3, %v4214_v58 }
  0xef   : > { %v523_v61 = vpop.f32.mrf.mxu0  ;;  %v566_v62 = vpop.f32.mrf.mxu1  ;;  %4559 = vmatprep.mubr.msk.bf16.mxu0 %vm4946_vm0, %v4945_v0 }
  0xf0   : > { %v917_v61 = vpack.c.bf16 %v434_v43, %v434_v43 }
  0xf1   : > { %v4462_v63 = vpop.f32.mrf.mxu0  ;;  %v4468_v42 = vpop.f32.mrf.mxu1 }
  0xf3   : > { %v606_v48 = vpop.f32.mrf.mxu0  ;;  %v5250_v49 = vpop.f32.mrf.mxu1 }
  0xf4   : > { %v4215_v50 = vpack.c.bf16 %v5250_v49, %v606_v48  ;;  %v922_v18 = vpack.c.bf16 %v5250_v49, %v5250_v49 }
  0xf5   : > { %v4473_v51 = vpop.f32.mrf.mxu0  ;;  %v4479_v52 = vpop.f32.mrf.mxu1 }
  0xf6   : > { %4560 = vmatmul.mubr.msk.bf16.vlgmr.msra.gmra.mxu0 %vm220_vm2, %v5016_v7  ;;  %4529 = vmatprep.mubr.msk.bf16.mxu1 %vm986_vm3, %v4215_v50  ;;  %v4930_v50 = vld [vmem:[%s5951_s2] sm:$0xff]   ;;  %v1454_v52 = vsel %vm224_vm1, %v917_v61, 0  ;;  %v1669_v19 = vsel %vm224_vm1, %v922_v18, 0 }
  0xf7   : > { %4570 = vmatpush3.bf16.msra.mxu0 %v1368_v53  ;;  %v609_v58 = vpop.f32.mrf.mxu0  ;;  %v652_v59 = vpop.f32.mrf.mxu1  ;;  %4571 = vmatprep.mubr.msk.bf16.mxu0 %vm4946_vm0, %v4945_v0 }
  0xf8   : > { %4581 = vmatprep.subr.bf16.mxu0 %v4945_v0 }
  0xf9   : > { %v4474_v55 = vpop.f32.mrf.mxu0  ;;  %v4480_v60 = vpop.f32.mrf.mxu1 }
  0xfa   : > { %v919_v55 = vpack.c.bf16 %v520_v54, %v520_v54 }
  0xfb   : > { %v692_v62 = vpop.f32.mrf.mxu0  ;;  %v5260_v63 = vpop.f32.mrf.mxu1 }
  0xfc   : > { %v4216_v42 = vpack.c.bf16 %v5260_v63, %v692_v62 }
  0xfd   : > { %v4485_v51 = vpop.f32.mrf.mxu0  ;;  %v4491_v47 = vpop.f32.mrf.mxu1 }
  0xfe   : > { %4530 = vmatmul.mubr.msk.bf16.vlgmr.msra.gmra.mxu1 %vm986_vm3, %v4216_v42  ;;  %4572 = vmatmul.mubr.msk.bf16.vlgmr.msra.gmra.mxu0 %vm220_vm2, %v5016_v7 }
  0xff   : > { %4582 = vmatpush3.bf16.msra.mxu0 %v1454_v52  ;;  %v695_v43 = vpop.f32.mrf.mxu0  ;;  %v738_v53 = vpop.f32.mrf.mxu1  ;;  %4583 = vmatprep.mubr.msk.bf16.mxu0 %vm4946_vm0, %v4945_v0  ;;  %v1540_v52 = vsel %vm224_vm1, %v919_v55, 0 }
 0x100   : > { %4593 = vmatprep.subr.bf16.mxu0 %v4945_v0  ;;  %4538 = vmatpush3.bf16.msra.mxu1 %v5227_v44  ;;  %v921_v53 = vpack.c.bf16 %v606_v48, %v606_v48 }
 0x101   : > { %v4486_v58 = vpop.f32.mrf.mxu0  ;;  %v4492_v59 = vpop.f32.mrf.mxu1  ;;  %4539 = vmatprep.subr.bf16.mxu1 %v4930_v50 }
 0x103   : > { %v778_v60 = vpop.f32.mrf.mxu0  ;;  %v5274_v42 = vpop.f32.mrf.mxu1 }
 0x104   : > { %v4217_v51 = vpack.c.bf16 %v5274_v42, %v778_v60  ;;  %4540 = vmatpush3.bf16.msra.mxu1 %v4930_v50  ;;  %v925_v3 = vpack.c.bf16 %v778_v60, %v778_v60  ;;  %v926_v22 = vpack.c.bf16 %v5274_v42, %v5274_v42 }
 0x105   : > { %v4497_v61 = vpop.f32.mrf.mxu0  ;;  %v4503_v47 = vpop.f32.mrf.mxu1  ;;  %4563 = vmatprep.subr.bf16.mxu1 %v4945_v0 }
 0x106   : > { %4584 = vmatmul.mubr.msk.bf16.vlgmr.msra.gmra.mxu0 %vm220_vm2, %v5016_v7  ;;  %4533 = vmatprep.mubr.msk.bf16.mxu1 %vm986_vm3, %v4217_v51  ;;  %v1626_v51 = vsel %vm224_vm1, %v921_v53, 0 }
 0x107   : > { %4594 = vmatpush3.bf16.msra.mxu0 %v1540_v52  ;;  %v781_v44 = vpop.f32.mrf.mxu0  ;;  %v824_v54 = vpop.f32.mrf.mxu1  ;;  %4595 = vmatprep.mubr.msk.bf16.mxu0 %vm4946_vm0, %v4945_v0 }
 0x108   : > { %4605 = vmatprep.subr.bf16.mxu0 %v4945_v0 }
 0x109   : > { %v4498_v50 = vpop.f32.mrf.mxu0  ;;  %v4504_v43 = vpop.f32.mrf.mxu1 }
 0x10a   : > { %v914_v50 = vpack.c.bf16 %v5230_v46, %v5230_v46  ;;  %v923_v43 = vpack.c.bf16 %v692_v62, %v692_v62 }
 0x10b   : > { %v864_v58 = vpop.f32.mrf.mxu0  ;;  %v5285_v59 = vpop.f32.mrf.mxu1 }
 0x10c   : > { %v4218_v61 = vpack.c.bf16 %v5285_v59, %v864_v58  ;;  %v1325_v1 = vsel %vm224_vm1, %v914_v50, 0  ;;  %v1712_v2 = vsel %vm224_vm1, %v923_v43, 0  ;;  %v927_v8 = vpack.c.bf16 %v864_v58, %v864_v58 }
 0x10d   : > { %v4509_v47 = vpop.f32.mrf.mxu0  ;;  %v4515_v55 = vpop.f32.mrf.mxu1  ;;  %v928_v24 = vpack.c.bf16 %v5285_v59, %v5285_v59 }
 0x10e   : > { %4534 = vmatmul.mubr.msk.bf16.gmra.mxu1 %vm986_vm3, %v4218_v61  ;;  %4596 = vmatmul.mubr.msk.bf16.vlgmr.msra.gmra.mxu0 %vm220_vm2, %v5016_v7 }
 0x10f   : > { %4606 = vmatpush3.bf16.msra.mxu0 %v1626_v51  ;;  %v867_v52 = vpop.f32.mrf.mxu0  ;;  %v910_v44 = vpop.f32.mrf.mxu1  ;;  %4541 = vmatprep.mubr.msk.bf16.mxu1 %vm986_vm3, %v4073_v6  ;;  %v1798_v6 = vsel %vm224_vm1, %v925_v3, 0  ;;  %v1927_v25 = vsel %vm224_vm1, %v928_v24, 0 }
 0x110   : > { %4607 = vmatprep.mubr.msk.bf16.mxu0 %vm4946_vm0, %v4945_v0  ;;  %4617 = vmatprep.subr.bf16.mxu0 %v4945_v0 }
 0x111   : > { %v4510_v48 = vpop.f32.mrf.mxu0  ;;  %v4516_v54 = vpop.f32.mrf.mxu1 }
 0x116   : > { %4542 = vmatmul.mubr.msk.bf16.vlgmr.msra.gmra.mxu1 %vm986_vm3, %v4074_v9  ;;  %4608 = vmatmul.mubr.msk.bf16.vlgmr.msra.gmra.mxu0 %vm220_vm2, %v5016_v7  ;;  %v1884_v9 = vsel %vm224_vm1, %v927_v8, 0 }
 0x117   : > { %4564 = vmatpush3.bf16.msra.mxu1 %v1325_v1  ;;  %4618 = vmatpush3.bf16.msra.mxu0 %v1712_v2 }
 0x118   : > { %4545 = vmatprep.mubr.msk.bf16.mxu1 %vm986_vm3, %v4075_v14  ;;  %4619 = vmatprep.mubr.msk.bf16.mxu0 %vm4946_vm0, %v4945_v0  ;;  %v918_v14 = vpack.c.bf16 %v5240_v45, %v5240_v45 }
 0x119   : > { %4629 = vmatprep.subr.bf16.mxu0 %v4945_v0  ;;  %4575 = vmatprep.subr.bf16.mxu1 %v4945_v0 }
 0x11a   : > { %v1497_v15 = vsel %vm224_vm1, %v918_v14, 0 }
 0x11e   : > { %4546 = vmatmul.mubr.msk.bf16.gmra.mxu1 %vm986_vm3, %v4076_v17  ;;  %4620 = vmatmul.mubr.msk.bf16.vlgmr.msra.gmra.mxu0 %vm220_vm2, %v5016_v7  ;;  %v1583_v17 = vsel %vm224_vm1, %v920_v16, 0 }
 0x11f   : > { %4630 = vmatpush3.bf16.msra.mxu0 %v1798_v6  ;;  %4549 = vmatprep.mubr.msk.bf16.mxu1 %vm986_vm3, %v4077_v20  ;;  %v924_v20 = vpack.c.bf16 %v5260_v63, %v5260_v63 }
 0x120   : > { %4631 = vmatprep.mubr.msk.bf16.mxu0 %vm4946_vm0, %v4945_v0  ;;  %4641 = vmatprep.subr.bf16.mxu0 %v4945_v0 }
 0x121   : > { %v1755_v21 = vsel %vm224_vm1, %v924_v20, 0 }
 0x126   : > { %4550 = vmatmul.mubr.msk.bf16.gmra.mxu1 %vm986_vm3, %v4078_v23  ;;  %4632 = vmatmul.mubr.msk.bf16.vlgmr.msra.gmra.mxu0 %vm220_vm2, %v5016_v7  ;;  %v1841_v23 = vsel %vm224_vm1, %v926_v22, 0 }
 0x127   : > { %4642 = vmatpush3.bf16.msra.mxu0 %v1884_v9  ;;  %4553 = vmatprep.mubr.msk.bf16.mxu1 %vm986_vm3, %v4079_v26  ;;  %v5417_v26 = vld [vmem:[%s5950_s1 + $0x4] sm:$0xf] }
 0x128   : > { %4643 = vmatprep.mubr.msk.bf16.mxu0 %vm4946_vm0, %v4945_v0 }
 0x12e   : > { %4554 = vmatmul.mubr.msk.bf16.gmra.mxu1 %vm986_vm3, %v4080_v29  ;;  %4644 = vmatmul.mubr.msk.bf16.vlgmr.msra.gmra.mxu0 %vm220_vm2, %v5016_v7 }
 0x12f   : > { %4565 = vmatprep.mubr.msk.bf16.mxu1 %vm4946_vm0, %v4945_v0 }
 0x136   : > { %4566 = vmatmul.mubr.msk.bf16.vlgmr.msra.gmra.mxu1 %vm220_vm2, %v5016_v7 }
 0x137   : > { %4576 = vmatpush3.bf16.msra.mxu1 %v1411_v11  ;;  %4577 = vmatprep.mubr.msk.bf16.mxu1 %vm4946_vm0, %v4945_v0 }
 0x138   : > { %4587 = vmatprep.subr.bf16.mxu1 %v4945_v0 }
 0x13e   : > { %4578 = vmatmul.mubr.msk.bf16.vlgmr.msra.gmra.mxu1 %vm220_vm2, %v5016_v7 }
 0x13f   : > { %4588 = vmatpush3.bf16.msra.mxu1 %v1497_v15  ;;  %4589 = vmatprep.mubr.msk.bf16.mxu1 %vm4946_vm0, %v4945_v0 }
 0x140   : > { %4599 = vmatprep.subr.bf16.mxu1 %v4945_v0 }
 0x146   : > { %4590 = vmatmul.mubr.msk.bf16.vlgmr.msra.gmra.mxu1 %vm220_vm2, %v5016_v7 }
 0x147   : > { %4600 = vmatpush3.bf16.msra.mxu1 %v1583_v17  ;;  %4601 = vmatprep.mubr.msk.bf16.mxu1 %vm4946_vm0, %v4945_v0 }
 0x148   : > { %4611 = vmatprep.subr.bf16.mxu1 %v4945_v0 }
 0x14e   : > { %4602 = vmatmul.mubr.msk.bf16.vlgmr.msra.gmra.mxu1 %vm220_vm2, %v5016_v7 }
 0x14f   : > { %4612 = vmatpush3.bf16.msra.mxu1 %v1669_v19  ;;  %4613 = vmatprep.mubr.msk.bf16.mxu1 %vm4946_vm0, %v4945_v0 }
 0x150   : > { %4623 = vmatprep.subr.bf16.mxu1 %v4945_v0 }
 0x156   : > { %4614 = vmatmul.mubr.msk.bf16.vlgmr.msra.gmra.mxu1 %vm220_vm2, %v5016_v7 }
 0x157   : > { %4624 = vmatpush3.bf16.msra.mxu1 %v1755_v21  ;;  %4625 = vmatprep.mubr.msk.bf16.mxu1 %vm4946_vm0, %v4945_v0 }
 0x158   : > { %4635 = vmatprep.subr.bf16.mxu1 %v4945_v0 }
 0x15e   : > { %4626 = vmatmul.mubr.msk.bf16.vlgmr.msra.gmra.mxu1 %vm220_vm2, %v5016_v7 }
 0x15f   : > { %4636 = vmatpush3.bf16.msra.mxu1 %v1841_v23  ;;  %4637 = vmatprep.mubr.msk.bf16.mxu1 %vm4946_vm0, %v4945_v0 }
 0x160   : > { %4647 = vmatprep.subr.bf16.mxu1 %v4945_v0 }
 0x166   : > { %4638 = vmatmul.mubr.msk.bf16.vlgmr.msra.gmra.mxu1 %vm220_vm2, %v5016_v7 }
 0x167   : > { %4648 = vmatpush3.bf16.msra.mxu1 %v1927_v25  ;;  %4649 = vmatprep.mubr.msk.bf16.mxu1 %vm4946_vm0, %v4945_v0 }
 0x168   : > { %4673 = vmatprep.subr.bf16.mxu1 %v4945_v0 }
 0x16e   : > { %4650 = vmatmul.mubr.msk.bf16.vlgmr.msra.gmra.mxu1 %vm220_vm2, %v5016_v7  ;;  %v4932_v7 = vld [vmem:[%s5951_s2 + $0x20] sm:$0xff]  }
 0x16f   : > { %4674 = vmatpush3.bf16.msra.mxu1 %v5005_v4  ;;  %4675 = vmatprep.mubr.msk.bf16.mxu1 %vm4946_vm0, %v4945_v0  ;;  %v4931_v4 = vld [vmem:[%s5951_s2 + $0x28] sm:$0xff]  }
 0x170   : > { %4679 = vmatprep.subr.bf16.mxu1 %v4945_v0  ;;  %4653 = vmatprep.subr.bf16.mxu0 %v4931_v4 }
 0x171   : > { %4654 = vmatpush3.bf16.msra.mxu0 %v4931_v4 }
 0x172   : > { %4655 = vmatprep.subr.bf16.mxu0 %v4932_v7 }
 0x175   : > { %4656 = vmatpush3.bf16.msra.mxu0 %v4932_v7 }
 0x176   : > { %4676 = vmatmul.mubr.msk.bf16.vlgmr.msra.gmra.mxu1 %vm220_vm2, %v5417_v26  ;;  %4697 = vmatprep.subr.bf16.mxu0 %v4945_v0 }
 0x177   : > { %4680 = vmatpush3.bf16.msra.mxu1 %v5009_v5  ;;  %4681 = vmatprep.mubr.msk.bf16.mxu1 %vm4946_vm0, %v4945_v0 }
 0x178   : > { %4685 = vmatprep.subr.bf16.mxu1 %v4945_v0 }
 0x17e   : > { %4682 = vmatmul.mubr.msk.bf16.vlgmr.msra.gmra.mxu1 %vm220_vm2, %v5417_v26 }
 0x17f   : > { %4686 = vmatpush3.bf16.msra.mxu1 %v5035_v12  ;;  %4687 = vmatprep.mubr.msk.bf16.mxu1 %vm4946_vm0, %v4945_v0 }
 0x180   : > { %4691 = vmatprep.subr.bf16.mxu1 %v4945_v0 }
 0x186   : > { %4688 = vmatmul.mubr.msk.bf16.vlgmr.msra.gmra.mxu1 %vm220_vm2, %v5417_v26 }
 0x187   : > { %4692 = vmatpush3.bf16.msra.mxu1 %v5039_v13  ;;  %4693 = vmatprep.mubr.msk.bf16.mxu1 %vm4946_vm0, %v4945_v0 }
 0x188   : > { %4703 = vmatprep.subr.bf16.mxu1 %v4945_v0 }
 0x18e   : > { %4694 = vmatmul.mubr.msk.bf16.vlgmr.msra.gmra.mxu1 %vm220_vm2, %v5417_v26 }
 0x18f   : > { %4704 = vmatpush3.bf16.msra.mxu1 %v5101_v31  ;;  %4705 = vmatprep.mubr.msk.bf16.mxu1 %vm4946_vm0, %v4945_v0 }
 0x190   : > { %4715 = vmatprep.subr.bf16.mxu1 %v4945_v0 }
 0x196   : > { %4706 = vmatmul.mubr.msk.bf16.vlgmr.msra.gmra.mxu1 %vm220_vm2, %v5417_v26 }
 0x197   : > { %4716 = vmatpush3.bf16.msra.mxu1 %v5121_v33  ;;  %4717 = vmatprep.mubr.msk.bf16.mxu1 %vm4946_vm0, %v4945_v0 }
 0x198   : > { %4727 = vmatprep.subr.bf16.mxu1 %v4945_v0 }
 0x19e   : > { %4718 = vmatmul.mubr.msk.bf16.vlgmr.msra.gmra.mxu1 %vm220_vm2, %v5417_v26  ;;  %v4523_v5 = vpop.f32.mrf.mxu0 }
 0x19f   : > { %4728 = vmatpush3.bf16.msra.mxu1 %v5141_v35  ;;  %4729 = vmatprep.mubr.msk.bf16.mxu1 %vm4946_vm0, %v4945_v0 }
 0x1a0   : > { %4739 = vmatprep.subr.bf16.mxu1 %v4945_v0  ;;  %v1045_v12 = vpop.f32.mrf.mxu0 }
 0x1a2   : > { %v4524_v13 = vpop.f32.mrf.mxu0 }
 0x1a4   : > { %v5468_v27 = vpop.f32.mrf.mxu0 }
 0x1a6   : > { %4730 = vmatmul.mubr.msk.bf16.vlgmr.msra.gmra.mxu1 %vm220_vm2, %v5417_v26 }
 0x1a7   : > { %4740 = vmatpush3.bf16.msra.mxu1 %v5161_v37  ;;  %4741 = vmatprep.mubr.msk.bf16.mxu1 %vm4946_vm0, %v4945_v0 }
 0x1a8   : > { %4751 = vmatprep.subr.bf16.mxu1 %v4945_v0 }
 0x1ae   : > { %v4527_v28 = vpop.f32.mrf.mxu0  ;;  %4742 = vmatmul.mubr.msk.bf16.vlgmr.msra.gmra.mxu1 %vm220_vm2, %v5417_v26 }
 0x1af   : > { %4752 = vmatpush3.bf16.msra.mxu1 %v5181_v39  ;;  %4753 = vmatprep.mubr.msk.bf16.mxu1 %vm4946_vm0, %v4945_v0 }
 0x1b0   : > { %v1061_v29 = vpop.f32.mrf.mxu0  ;;  %4763 = vmatprep.subr.bf16.mxu1 %v4945_v0 }
 0x1b2   : > { %v4528_v31 = vpop.f32.mrf.mxu0 }
 0x1b4   : > { %v5476_v33 = vpop.f32.mrf.mxu0 }
 0x1b6   : > { %v5478_v35 = vpop.f32.mrf.mxu0  ;;  %4754 = vmatmul.mubr.msk.bf16.vlgmr.msra.gmra.mxu1 %vm220_vm2, %v5417_v26 }
 0x1b7   : > { %4764 = vmatpush3.bf16.msra.mxu1 %v5201_v41  ;;  %4765 = vmatprep.mubr.msk.bf16.mxu1 %vm4946_vm0, %v4945_v0 }
 0x1b8   : > { %v4561_v37 = vpop.f32.mrf.mxu0  ;;  %4789 = vmatprep.subr.bf16.mxu1 %v4945_v0 }
 0x1ba   : > { %v1321_v39 = vpop.f32.mrf.mxu0 }
 0x1bc   : > { %v4562_v46 = vpop.f32.mrf.mxu0 }
 0x1be   : > { %v5486_v56 = vpop.f32.mrf.mxu0  ;;  %4766 = vmatmul.mubr.msk.bf16.vlgmr.msra.gmra.mxu1 %vm220_vm2, %v5417_v26  ;;  %v4531_v45 = vpop.f32.mrf.mxu1 }
 0x1bf   : > { %4791 = vmatprep.mubr.msk.bf16.mxu1 %vm4946_vm0, %v4945_v0 }
 0x1c0   : > { %v4573_v57 = vpop.f32.mrf.mxu0  ;;  %v1077_v41 = vpop.f32.mrf.mxu1 }
 0x1c2   : > { %v1407_v49 = vpop.f32.mrf.mxu0  ;;  %v4532_v60 = vpop.f32.mrf.mxu1 }
 0x1c4   : > { %v4574_v62 = vpop.f32.mrf.mxu0  ;;  %v5494_v58 = vpop.f32.mrf.mxu1 }
 0x1c6   : > { %v5492_v63 = vpop.f32.mrf.mxu0 }
 0x1c8   : > { %v4585_v42 = vpop.f32.mrf.mxu0 }
 0x1ca   : > { %v1493_v53 = vpop.f32.mrf.mxu0 }
 0x1cc   : > { %v4586_v59 = vpop.f32.mrf.mxu0 }
 0x1ce   : > { %v4535_v61 = vpop.f32.mrf.mxu1  ;;  %v5496_v47 = vpop.f32.mrf.mxu0 }
 0x1d0   : > { %v1093_v55 = vpop.f32.mrf.mxu1  ;;  %v4597_v51 = vpop.f32.mrf.mxu0 }
 0x1d2   : > { %v4536_v52 = vpop.f32.mrf.mxu1  ;;  %v1579_v44 = vpop.f32.mrf.mxu0 }
 0x1d4   : > { %v5498_v48 = vpop.f32.mrf.mxu1  ;;  %v4598_v54 = vpop.f32.mrf.mxu0 }
 0x1d6   : > { %v4543_v50 = vpop.f32.mrf.mxu1  ;;  %v5500_v43 = vpop.f32.mrf.mxu0 }
 0x1d7   : > { %v5502_v1 = vadd.f32 %v4543_v50, %v4523_v5 }
 0x1d8   : > { %v1218_v2 = vpop.f32.mrf.mxu1  ;;  %v4609_v3 = vpop.f32.mrf.mxu0 }
 0x1d9   : > { %v5504_v6 = vadd.f32 %v1218_v2, %v1045_v12 }
 0x1da   : > { %v4544_v8 = vpop.f32.mrf.mxu1  ;;  %v1665_v9 = vpop.f32.mrf.mxu0 }
 0x1db   : > { %v5506_v10 = vadd.f32 %v4544_v8, %v4524_v13 }
 0x1dc   : > { %v5508_v11 = vpop.f32.mrf.mxu1  ;;  %v4610_v14 = vpop.f32.mrf.mxu0 }
 0x1de   : > { %v4547_v15 = vpop.f32.mrf.mxu1  ;;  %v5510_v16 = vpop.f32.mrf.mxu0 }
 0x1df   : > { %v5512_v17 = vadd.f32 %v4547_v15, %v4527_v28 }
 0x1e0   : > { %v1234_v18 = vpop.f32.mrf.mxu1  ;;  %v4621_v19 = vpop.f32.mrf.mxu0 }
 0x1e1   : > { %v5514_v20 = vadd.f32 %v1234_v18, %v1061_v29 }
 0x1e2   : > { %v4548_v21 = vpop.f32.mrf.mxu1  ;;  %v1751_v22 = vpop.f32.mrf.mxu0 }
 0x1e3   : > { %v5516_v23 = vadd.f32 %v4548_v21, %v4528_v31 }
 0x1e4   : > { %v5518_v24 = vpop.f32.mrf.mxu1  ;;  %v4622_v25 = vpop.f32.mrf.mxu0 }
 0x1e6   : > { %v4551_v4 = vpop.f32.mrf.mxu1  ;;  %v5520_v7 = vpop.f32.mrf.mxu0 }
 0x1e7   : > { %v5522_v5 = vadd.f32 %v4551_v4, %v4531_v45 }
 0x1e8   : > { %v1250_v12 = vpop.f32.mrf.mxu1  ;;  %v4633_v13 = vpop.f32.mrf.mxu0 }
 0x1e9   : > { %v5524_v28 = vadd.f32 %v1250_v12, %v1077_v41 }
 0x1ea   : > { %v4552_v37 = vpop.f32.mrf.mxu1  ;;  %v1837_v39 = vpop.f32.mrf.mxu0 }
 0x1eb   : > { %v5526_v29 = vadd.f32 %v4552_v37, %v4532_v60 }
 0x1ec   : > { %v5528_v46 = vpop.f32.mrf.mxu1  ;;  %v4634_v31 = vpop.f32.mrf.mxu0 }
 0x1ee   : > { %v4555_v57 = vpop.f32.mrf.mxu1  ;;  %v1920_v49 = vpop.f32.mrf.mxu0 }
 0x1ef   : > { %v5530_v62 = vadd.f32 %v4555_v57, %v4535_v61 }
 0x1f0   : > { %v1266_v42 = vpop.f32.mrf.mxu1  ;;  %v4645_v53 = vpop.f32.mrf.mxu0 }
 0x1f1   : > { %v5532_v59 = vadd.f32 %v1266_v42, %v1093_v55 }
 0x1f2   : > { %v4556_v45 = vpop.f32.mrf.mxu1  ;;  %v1923_v51 = vpop.f32.mrf.mxu0 }
 0x1f3   : > { %v5534_v44 = vadd.f32 %v4556_v45, %v4536_v52 }
 0x1f4   : > { %v5536_v41 = vpop.f32.mrf.mxu1  ;;  %v4646_v54 = vpop.f32.mrf.mxu0 }
 0x1f6   : > { %v1361_v60 = vpop.f32.mrf.mxu1 }
 0x1f7   : > { %v4219_v50 = vpack.c.bf16 %v1361_v60, %v5478_v35 }
 0x1f8   : > { %v4567_v2 = vpop.f32.mrf.mxu1 }
 0x1f9   : > { %4657 = vmatprep.mubr.msk.bf16.mxu0 %vm986_vm3, %v4219_v50 }
 0x1fa   : > { %v1364_v3 = vpop.f32.mrf.mxu1 }
 0x1fc   : > { %v4568_v61 = vpop.f32.mrf.mxu1 }
 0x1fe   : > { %v1447_v8 = vpop.f32.mrf.mxu1 }
 0x1ff   : > { %v4220_v9 = vpack.c.bf16 %v1447_v8, %v5486_v56 }
 0x200   : > { %v4579_v55 = vpop.f32.mrf.mxu1 }
 0x201   : > { %4658 = vmatmul.mubr.msk.bf16.vlgmr.msra.gmra.mxu0 %vm986_vm3, %v4220_v9 }
 0x202   : > { %v1450_v14 = vpop.f32.mrf.mxu1  ;;  %4698 = vmatpush3.bf16.msra.mxu0 %v5097_v30 }
 0x203   : > { %4709 = vmatprep.subr.bf16.mxu0 %v4945_v0 }
 0x204   : > { %v4580_v52 = vpop.f32.mrf.mxu1 }
 0x206   : > { %v1533_v15 = vpop.f32.mrf.mxu1 }
 0x207   : > { %v4221_v35 = vpack.c.bf16 %v1533_v15, %v5492_v63 }
 0x208   : > { %v4591_v18 = vpop.f32.mrf.mxu1 }
 0x209   : > { %4661 = vmatprep.mubr.msk.bf16.mxu0 %vm986_vm3, %v4221_v35 }
 0x20a   : > { %v1536_v19 = vpop.f32.mrf.mxu1 }
 0x20c   : > { %v4592_v21 = vpop.f32.mrf.mxu1 }
 0x20e   : > { %v1619_v22 = vpop.f32.mrf.mxu1 }
 0x20f   : > { %v4222_v56 = vpack.c.bf16 %v1619_v22, %v5496_v47 }
 0x210   : > { %v4603_v25 = vpop.f32.mrf.mxu1 }
 0x211   : > { %4662 = vmatmul.mubr.msk.bf16.gmra.mxu0 %vm986_vm3, %v4222_v56 }
 0x212   : > { %v1622_v4 = vpop.f32.mrf.mxu1 }
 0x214   : > { %v4604_v12 = vpop.f32.mrf.mxu1 }
 0x216   : > { %v1705_v30 = vpop.f32.mrf.mxu1 }
 0x217   : > { %v4223_v13 = vpack.c.bf16 %v1705_v30, %v5500_v43 }
 0x218   : > { %v4615_v37 = vpop.f32.mrf.mxu1 }
 0x219   : > { %4665 = vmatprep.mubr.msk.bf16.mxu0 %vm986_vm3, %v4223_v13 }
 0x21a   : > { %v1708_v63 = vpop.f32.mrf.mxu1 }
 0x21c   : > { %v4616_v39 = vpop.f32.mrf.mxu1 }
 0x21d   : > { %v4933_v39 = vld [vmem:[%s5951_s2 + $0x38] sm:$0xff]  }
 0x21e   : > { %v1791_v31 = vpop.f32.mrf.mxu1 }
 0x21f   : > { %v4224_v57 = vpack.c.bf16 %v1791_v31, %v5510_v16  ;;  %v4934_v31 = vld [vmem:[%s5951_s2 + $0x30] sm:$0xff]  }
 0x220   : > { %v4627_v42 = vpop.f32.mrf.mxu1 }
 0x221   : > { %4666 = vmatmul.mubr.msk.bf16.gmra.mxu0 %vm986_vm3, %v4224_v57 }
 0x222   : > { %v1794_v47 = vpop.f32.mrf.mxu1 }
 0x224   : > { %v4628_v53 = vpop.f32.mrf.mxu1 }
 0x226   : > { %v1877_v45 = vpop.f32.mrf.mxu1 }
 0x227   : > { %v4225_v51 = vpack.c.bf16 %v1877_v45, %v5520_v7 }
 0x228   : > { %v4639_v54 = vpop.f32.mrf.mxu1 }
 0x229   : > { %4669 = vmatprep.mubr.msk.bf16.mxu0 %vm986_vm3, %v4225_v51 }
 0x22a   : > { %v1880_v43 = vpop.f32.mrf.mxu1 }
 0x22c   : > { %v4640_v60 = vpop.f32.mrf.mxu1 }
 0x22e   : > { %v1963_v50 = vpop.f32.mrf.mxu1 }
 0x22f   : > { %v4226_v2 = vpack.c.bf16 %v1963_v50, %v1920_v49 }
 0x230   : > { %v4651_v3 = vpop.f32.mrf.mxu1 }
 0x231   : > { %4670 = vmatmul.mubr.msk.bf16.gmra.mxu0 %vm986_vm3, %v4226_v2 }
 0x232   : > { %v1966_v61 = vpop.f32.mrf.mxu1  ;;  %4699 = vmatprep.mubr.msk.bf16.mxu0 %vm4946_vm0, %v4945_v0 }
 0x234   : > { %v4652_v16 = vpop.f32.mrf.mxu1 }
 0x236   : > { %v5557_v8 = vpop.f32.mrf.mxu1 }
 0x237   : > { %v2824_v7 = vpack.c.bf16 %v5557_v8, %v5557_v8 }
 0x238   : > { %v4677_v9 = vpop.f32.mrf.mxu1 }
 0x239   : > { %4700 = vmatmul.mubr.msk.bf16.vlgmr.msra.gmra.mxu0 %vm220_vm2, %v5417_v26  ;;  %v3035_v55 = vsel %vm224_vm1, %v2824_v7, 0 }
 0x23a   : > { %4710 = vmatpush3.bf16.msra.mxu0 %v5117_v32  ;;  %4711 = vmatprep.mubr.msk.bf16.mxu0 %vm4946_vm0, %v4945_v0  ;;  %v2221_v49 = vpop.f32.mrf.mxu1 }
 0x23b   : > { %4721 = vmatprep.subr.bf16.mxu0 %v4945_v0  ;;  %4790 = vmatpush3.bf16.msra.mxu1 %v3035_v55 }
 0x23c   : > { %v4678_v14 = vpop.f32.mrf.mxu1  ;;  %4795 = vmatprep.subr.bf16.mxu1 %v4945_v0 }
 0x23e   : > { %v2258_v52 = vpop.f32.mrf.mxu1  ;;  %4792 = vmatmul.mubr.msk.bf16.vlgmr.msra.gmra.mxu1 %vm220_vm2, %v5417_v26 }
 0x23f   : > { %v2825_v15 = vpack.c.bf16 %v2258_v52, %v2258_v52  ;;  %4797 = vmatprep.mubr.msk.bf16.mxu1 %vm4946_vm0, %v4945_v0 }
 0x240   : > { %v4683_v35 = vpop.f32.mrf.mxu1 }
 0x241   : > { %4712 = vmatmul.mubr.msk.bf16.vlgmr.msra.gmra.mxu0 %vm220_vm2, %v5417_v26  ;;  %v3078_v32 = vsel %vm224_vm1, %v2825_v15, 0 }
 0x242   : > { %4722 = vmatpush3.bf16.msra.mxu0 %v5137_v34  ;;  %4723 = vmatprep.mubr.msk.bf16.mxu0 %vm4946_vm0, %v4945_v0  ;;  %v2261_v18 = vpop.f32.mrf.mxu1 }
 0x243   : > { %4733 = vmatprep.subr.bf16.mxu0 %v4945_v0  ;;  %4796 = vmatpush3.bf16.msra.mxu1 %v3078_v32 }
 0x244   : > { %v4684_v19 = vpop.f32.mrf.mxu1  ;;  %4801 = vmatprep.subr.bf16.mxu1 %v4945_v0 }
 0x246   : > { %v2298_v21 = vpop.f32.mrf.mxu1  ;;  %4798 = vmatmul.mubr.msk.bf16.vlgmr.msra.gmra.mxu1 %vm220_vm2, %v5417_v26 }
 0x247   : > { %v2826_v22 = vpack.c.bf16 %v2298_v21, %v2298_v21  ;;  %4803 = vmatprep.mubr.msk.bf16.mxu1 %vm4946_vm0, %v4945_v0 }
 0x248   : > { %v4689_v56 = vpop.f32.mrf.mxu1 }
 0x249   : > { %4724 = vmatmul.mubr.msk.bf16.vlgmr.msra.gmra.mxu0 %vm220_vm2, %v5417_v26  ;;  %v3121_v34 = vsel %vm224_vm1, %v2826_v22, 0 }
 0x24a   : > { %4734 = vmatpush3.bf16.msra.mxu0 %v5157_v36  ;;  %4735 = vmatprep.mubr.msk.bf16.mxu0 %vm4946_vm0, %v4945_v0  ;;  %v2301_v25 = vpop.f32.mrf.mxu1 }
 0x24b   : > { %4745 = vmatprep.subr.bf16.mxu0 %v4945_v0  ;;  %4802 = vmatpush3.bf16.msra.mxu1 %v3121_v34 }
 0x24c   : > { %v4690_v4 = vpop.f32.mrf.mxu1  ;;  %4807 = vmatprep.subr.bf16.mxu1 %v4945_v0 }
 0x24e   : > { %v2338_v12 = vpop.f32.mrf.mxu1  ;;  %4804 = vmatmul.mubr.msk.bf16.vlgmr.msra.gmra.mxu1 %vm220_vm2, %v5417_v26 }
 0x24f   : > { %v2827_v30 = vpack.c.bf16 %v2338_v12, %v2338_v12  ;;  %4809 = vmatprep.mubr.msk.bf16.mxu1 %vm4946_vm0, %v4945_v0  ;;  %v4228_v57 = vpack.c.bf16 %v2338_v12, %v2298_v21 }
 0x250   : > { %v4695_v13 = vpop.f32.mrf.mxu1 }
 0x251   : > { %4736 = vmatmul.mubr.msk.bf16.vlgmr.msra.gmra.mxu0 %vm220_vm2, %v5417_v26  ;;  %v3164_v36 = vsel %vm224_vm1, %v2827_v30, 0 }
 0x252   : > { %4746 = vmatpush3.bf16.msra.mxu0 %v5177_v38  ;;  %4747 = vmatprep.mubr.msk.bf16.mxu0 %vm4946_vm0, %v4945_v0  ;;  %v2341_v37 = vpop.f32.mrf.mxu1  ;;  %v4227_v38 = vpack.c.bf16 %v2258_v52, %v5557_v8 }
 0x253   : > { %4757 = vmatprep.subr.bf16.mxu0 %v4945_v0  ;;  %4808 = vmatpush3.bf16.msra.mxu1 %v3164_v36 }
 0x254   : > { %v4696_v63 = vpop.f32.mrf.mxu1  ;;  %4819 = vmatprep.subr.bf16.mxu1 %v4945_v0 }
 0x256   : > { %4810 = vmatmul.mubr.msk.bf16.vlgmr.msra.gmra.mxu1 %vm220_vm2, %v5417_v26 }
 0x257   : > { %4821 = vmatprep.mubr.msk.bf16.mxu1 %vm4946_vm0, %v4945_v0 }
 0x259   : > { %4748 = vmatmul.mubr.msk.bf16.vlgmr.msra.gmra.mxu0 %vm220_vm2, %v5417_v26 }
 0x25a   : > { %4758 = vmatpush3.bf16.msra.mxu0 %v5197_v40  ;;  %4759 = vmatprep.mubr.msk.bf16.mxu0 %vm4946_vm0, %v4945_v0  ;;  %v5626_v40 = vpop.f32.mrf.mxu1 }
 0x25b   : > { %4769 = vmatprep.subr.bf16.mxu0 %v4933_v39  ;;  %v2829_v53 = vpack.c.bf16 %v5626_v40, %v5626_v40 }
 0x25c   : > { %v4707_v42 = vpop.f32.mrf.mxu1 }
 0x25d   : > { %v3250_v54 = vsel %vm224_vm1, %v2829_v53, 0 }
 0x25e   : > { %v2421_v47 = vpop.f32.mrf.mxu1  ;;  %4820 = vmatpush3.bf16.msra.mxu1 %v3250_v54 }
 0x25f   : > { %4831 = vmatprep.subr.bf16.mxu1 %v4945_v0 }
 0x260   : > { %v4708_v45 = vpop.f32.mrf.mxu1 }
 0x261   : > { %4760 = vmatmul.mubr.msk.bf16.vlgmr.msra.gmra.mxu0 %vm220_vm2, %v5417_v26  ;;  %4822 = vmatmul.mubr.msk.bf16.vlgmr.msra.gmra.mxu1 %vm220_vm2, %v5417_v26 }
 0x262   : > { %4770 = vmatpush3.bf16.msra.mxu0 %v4933_v39  ;;  %4773 = vmatprep.mubr.msk.bf16.mxu0 %vm986_vm3, %v4227_v38  ;;  %v5630_v51 = vpop.f32.mrf.mxu1 }
 0x263   : > { %4771 = vmatprep.subr.bf16.mxu0 %v4934_v31  ;;  %v2831_v50 = vpack.c.bf16 %v5630_v51, %v5630_v51  ;;  %4833 = vmatprep.mubr.msk.bf16.mxu1 %vm4946_vm0, %v4945_v0 }
 0x264   : > { %v4719_v43 = vpop.f32.mrf.mxu1 }
 0x265   : > { %v3336_v61 = vsel %vm224_vm1, %v2831_v50, 0 }
 0x266   : > { %4772 = vmatpush3.bf16.msra.mxu0 %v4934_v31  ;;  %v2501_v60 = vpop.f32.mrf.mxu1  ;;  %4832 = vmatpush3.bf16.msra.mxu1 %v3336_v61 }
 0x267   : > { %4813 = vmatprep.subr.bf16.mxu0 %v4945_v0  ;;  %4843 = vmatprep.subr.bf16.mxu1 %v4945_v0 }
 0x268   : > { %v4720_v2 = vpop.f32.mrf.mxu1 }
 0x269   : > { %4774 = vmatmul.mubr.msk.bf16.vlgmr.msra.gmra.mxu0 %vm986_vm3, %v4228_v57  ;;  %4834 = vmatmul.mubr.msk.bf16.vlgmr.msra.gmra.mxu1 %vm220_vm2, %v5417_v26 }
 0x26a   : > { %v5640_v3 = vpop.f32.mrf.mxu1  ;;  %4845 = vmatprep.mubr.msk.bf16.mxu1 %vm4946_vm0, %v4945_v0 }
 0x26b   : > { %v2833_v7 = vpack.c.bf16 %v5640_v3, %v5640_v3 }
 0x26c   : > { %v4731_v16 = vpop.f32.mrf.mxu1 }
 0x26d   : > { %v3422_v49 = vsel %vm224_vm1, %v2833_v7, 0 }
 0x26e   : > { %v2581_v8 = vpop.f32.mrf.mxu1  ;;  %4844 = vmatpush3.bf16.msra.mxu1 %v3422_v49 }
 0x26f   : > { %4855 = vmatprep.subr.bf16.mxu1 %v4945_v0 }
 0x270   : > { %v4732_v9 = vpop.f32.mrf.mxu1 }
 0x271   : > { %4846 = vmatmul.mubr.msk.bf16.vlgmr.msra.gmra.mxu1 %vm220_vm2, %v5417_v26 }
 0x272   : > { %v5650_v55 = vpop.f32.mrf.mxu1  ;;  %4857 = vmatprep.mubr.msk.bf16.mxu1 %vm4946_vm0, %v4945_v0 }
 0x273   : > { %v2835_v15 = vpack.c.bf16 %v5650_v55, %v5650_v55 }
 0x274   : > { %v4743_v14 = vpop.f32.mrf.mxu1 }
 0x275   : > { %v3508_v18 = vsel %vm224_vm1, %v2835_v15, 0 }
 0x276   : > { %v2661_v52 = vpop.f32.mrf.mxu1  ;;  %4856 = vmatpush3.bf16.msra.mxu1 %v3508_v18 }
 0x277   : > { %4867 = vmatprep.subr.bf16.mxu1 %v4945_v0 }
 0x278   : > { %v4744_v35 = vpop.f32.mrf.mxu1 }
 0x279   : > { %4858 = vmatmul.mubr.msk.bf16.vlgmr.msra.gmra.mxu1 %vm220_vm2, %v5417_v26 }
 0x27a   : > { %v5660_v32 = vpop.f32.mrf.mxu1  ;;  %4869 = vmatprep.mubr.msk.bf16.mxu1 %vm4946_vm0, %v4945_v0 }
 0x27b   : > { %v2837_v22 = vpack.c.bf16 %v5660_v32, %v5660_v32 }
 0x27c   : > { %v4755_v19 = vpop.f32.mrf.mxu1 }
 0x27d   : > { %v3594_v25 = vsel %vm224_vm1, %v2837_v22, 0 }
 0x27e   : > { %v2741_v21 = vpop.f32.mrf.mxu1  ;;  %4868 = vmatpush3.bf16.msra.mxu1 %v3594_v25 }
 0x27f   : > { %4879 = vmatprep.subr.bf16.mxu1 %v4945_v0 }
 0x280   : > { %v4756_v56 = vpop.f32.mrf.mxu1 }
 0x281   : > { %4870 = vmatmul.mubr.msk.bf16.vlgmr.msra.gmra.mxu1 %vm220_vm2, %v5417_v26 }
 0x282   : > { %v5670_v34 = vpop.f32.mrf.mxu1  ;;  %4881 = vmatprep.mubr.msk.bf16.mxu1 %vm4946_vm0, %v4945_v0 }
 0x283   : > { %v2839_v30 = vpack.c.bf16 %v5670_v34, %v5670_v34 }
 0x284   : > { %v4767_v4 = vpop.f32.mrf.mxu1 }
 0x285   : > { %v3680_v36 = vsel %vm224_vm1, %v2839_v30, 0 }
 0x286   : > { %v2821_v12 = vpop.f32.mrf.mxu1  ;;  %4880 = vmatpush3.bf16.msra.mxu1 %v3680_v36 }
 0x288   : > { %v4768_v13 = vpop.f32.mrf.mxu1 }
 0x289   : > { %4882 = vmatmul.mubr.msk.bf16.vlgmr.msra.gmra.mxu1 %vm220_vm2, %v5417_v26 }
 0x2c1   : > { %v4659_v37 = vpop.f32.mrf.mxu0 }
 0x2c2   : > { %v5684_v63 = vadd.f32 %v4659_v37, %v5502_v1 }
 0x2c3   : > { %v2100_v39 = vpop.f32.mrf.mxu0 }
 0x2c4   : > { %v5687_v38 = vadd.f32 %v2100_v39, %v5504_v6 }
 0x2c5   : > { %v4660_v31 = vpop.f32.mrf.mxu0 }
 0x2c6   : > { %v5690_v57 = vadd.f32 %v4660_v31, %v5506_v10 }
 0x2c7   : > { %v5692_v42 = vpop.f32.mrf.mxu0 }
 0x2d1   : > { %v4663_v47 = vpop.f32.mrf.mxu0 }
 0x2d2   : > { %v5695_v53 = vadd.f32 %v4663_v47, %v5512_v17 }
 0x2d3   : > { %v2116_v45 = vpop.f32.mrf.mxu0 }
 0x2d4   : > { %v5698_v54 = vadd.f32 %v2116_v45, %v5514_v20 }
 0x2d5   : > { %v4664_v1 = vpop.f32.mrf.mxu0 }
 0x2d6   : > { %v5701_v43 = vadd.f32 %v4664_v1, %v5516_v23 }
 0x2d7   : > { %v5703_v6 = vpop.f32.mrf.mxu0 }
 0x2e1   : > { %v4667_v60 = vpop.f32.mrf.mxu0 }
 0x2e2   : > { %v5706_v10 = vadd.f32 %v4667_v60, %v5522_v5 }
 0x2e3   : > { %v2132_v50 = vpop.f32.mrf.mxu0 }
 0x2e4   : > { %v5709_v2 = vadd.f32 %v2132_v50, %v5524_v28 }
 0x2e5   : > { %v4668_v17 = vpop.f32.mrf.mxu0 }
 0x2e6   : > { %v5712_v61 = vadd.f32 %v4668_v17, %v5526_v29 }
 0x2e7   : > { %v5714_v20 = vpop.f32.mrf.mxu0 }
 0x2f1   : > { %v4671_v16 = vpop.f32.mrf.mxu0 }
 0x2f2   : > { %v5717_v23 = vadd.f32 %v4671_v16, %v5530_v62 }
 0x2f3   : > { %v2148_v8 = vpop.f32.mrf.mxu0 }
 0x2f4   : > { %v5720_v7 = vadd.f32 %v2148_v8, %v5532_v59 }
 0x2f5   : > { %v4672_v5 = vpop.f32.mrf.mxu0 }
 0x2f6   : > { %v5723_v9 = vadd.f32 %v4672_v5, %v5534_v44 }
 0x2f7   : > { %v5725_v28 = vpop.f32.mrf.mxu0 }
 0x2f9   : > { %v2378_v49 = vpop.f32.mrf.mxu0 }
 0x2fa   : > { %v2828_v14 = vpack.c.bf16 %v2378_v49, %v2378_v49  ;;  %v4229_v29 = vpack.c.bf16 %v5626_v40, %v2378_v49 }
 0x2fb   : > { %v4701_v52 = vpop.f32.mrf.mxu0 }
 0x2fc   : > { %4777 = vmatprep.mubr.msk.bf16.mxu0 %vm986_vm3, %v4229_v29  ;;  %v3207_v62 = vsel %vm224_vm1, %v2828_v14, 0 }
 0x2fd   : > { %v2381_v15 = vpop.f32.mrf.mxu0  ;;  %4814 = vmatpush3.bf16.msra.mxu0 %v3207_v62 }
 0x2fe   : > { %4825 = vmatprep.subr.bf16.mxu0 %v4945_v0  ;;  %v5731_v59 = vpop.f32.mrf.mxu1 }
 0x2ff   : > { %v4702_v35 = vpop.f32.mrf.mxu0 }
 0x300   : > { %v4793_v44 = vpop.f32.mrf.mxu1 }
 0x301   : > { %v2458_v18 = vpop.f32.mrf.mxu0 }
 0x302   : > { %v4230_v19 = vpack.c.bf16 %v5630_v51, %v2458_v18  ;;  %v3074_v21 = vpop.f32.mrf.mxu1 }
 0x303   : > { %v4713_v22 = vpop.f32.mrf.mxu0 }
 0x304   : > { %4778 = vmatmul.mubr.msk.bf16.gmra.mxu0 %vm986_vm3, %v4230_v19  ;;  %v4794_v40 = vpop.f32.mrf.mxu1 }
 0x305   : > { %v2461_v56 = vpop.f32.mrf.mxu0 }
 0x306   : > { %v5735_v25 = vpop.f32.mrf.mxu1 }
 0x307   : > { %v4714_v4 = vpop.f32.mrf.mxu0  ;;  %v4235_v12 = vpack.c.bf16 %v5735_v25, %v5731_v59 }
 0x308   : > { %v4799_v30 = vpop.f32.mrf.mxu1 }
 0x309   : > { %v2538_v13 = vpop.f32.mrf.mxu0  ;;  %v2830_v30 = vpack.c.bf16 %v2458_v18, %v2458_v18 }
 0x30a   : > { %v4231_v36 = vpack.c.bf16 %v5640_v3, %v2538_v13  ;;  %v3117_v37 = vpop.f32.mrf.mxu1 }
 0x30b   : > { %v4725_v39 = vpop.f32.mrf.mxu0 }
 0x30c   : > { %4781 = vmatprep.mubr.msk.bf16.mxu0 %vm986_vm3, %v4231_v36  ;;  %v4800_v51 = vpop.f32.mrf.mxu1 }
 0x30d   : > { %v2541_v31 = vpop.f32.mrf.mxu0 }
 0x30e   : > { %v5741_v47 = vpop.f32.mrf.mxu1 }
 0x30f   : > { %v4726_v45 = vpop.f32.mrf.mxu0 }
 0x310   : > { %v4805_v1 = vpop.f32.mrf.mxu1 }
 0x311   : > { %v2618_v60 = vpop.f32.mrf.mxu0  ;;  %v4935_v1 = vld [vmem:[%s5951_s2 + $0x48] sm:$0xff]  }
 0x312   : > { %v4232_v50 = vpack.c.bf16 %v5650_v55, %v2618_v60  ;;  %v3160_v17 = vpop.f32.mrf.mxu1  ;;  %v2834_v31 = vpack.c.bf16 %v2618_v60, %v2618_v60 }
 0x313   : > { %v4737_v16 = vpop.f32.mrf.mxu0 }
 0x314   : > { %4782 = vmatmul.mubr.msk.bf16.gmra.mxu0 %vm986_vm3, %v4232_v50  ;;  %v4806_v8 = vpop.f32.mrf.mxu1  ;;  %v4936_v50 = vld [vmem:[%s5951_s2 + $0x40] sm:$0xff]  }
 0x315   : > { %v2621_v5 = vpop.f32.mrf.mxu0 }
 0x316   : > { %v5745_v3 = vpop.f32.mrf.mxu1 }
 0x317   : > { %v4738_v49 = vpop.f32.mrf.mxu0  ;;  %v4236_v14 = vpack.c.bf16 %v5745_v3, %v5741_v47 }
 0x318   : > { %v4811_v29 = vpop.f32.mrf.mxu1 }
 0x319   : > { %v2698_v52 = vpop.f32.mrf.mxu0 }
 0x31a   : > { %v4233_v62 = vpack.c.bf16 %v5660_v32, %v2698_v52  ;;  %v3203_v15 = vpop.f32.mrf.mxu1 }
 0x31b   : > { %v4749_v35 = vpop.f32.mrf.mxu0 }
 0x31c   : > { %4785 = vmatprep.mubr.msk.bf16.mxu0 %vm986_vm3, %v4233_v62  ;;  %v4812_v55 = vpop.f32.mrf.mxu1 }
 0x31d   : > { %v2701_v44 = vpop.f32.mrf.mxu0 }
 0x31f   : > { %v4750_v19 = vpop.f32.mrf.mxu0 }
 0x321   : > { %v2778_v21 = vpop.f32.mrf.mxu0  ;;  %v3286_v17 = vpop.f32.mrf.mxu1 }
 0x322   : > { %v4234_v22 = vpack.c.bf16 %v5670_v34, %v2778_v21  ;;  %v3293_v34 = vsel %vm224_vm1, %v2830_v30, 0  ;;  %v2838_v45 = vpack.c.bf16 %v2778_v21, %v2778_v21 }
 0x323   : > { %v4761_v40 = vpop.f32.mrf.mxu0 }
 0x324   : > { %4786 = vmatmul.mubr.msk.bf16.gmra.mxu0 %vm986_vm3, %v4234_v22  ;;  %v3637_v60 = vsel %vm224_vm1, %v2838_v45, 0 }
 0x325   : > { %v2781_v56 = vpop.f32.mrf.mxu0  ;;  %4815 = vmatprep.mubr.msk.bf16.mxu0 %vm4946_vm0, %v4945_v0 }
 0x327   : > { %v4762_v4 = vpop.f32.mrf.mxu0 }
 0x329   : > { %v4775_v32 = vpop.f32.mrf.mxu0 }
 0x32a   : > { %v5756_v36 = vadd.f32 %v4775_v32, %v5684_v63  ;;  %v2832_v63 = vpack.c.bf16 %v2538_v13, %v2538_v13  ;;  %v2836_v13 = vpack.c.bf16 %v2698_v52, %v2698_v52 }
 0x32b   : > { %v2955_v37 = vpop.f32.mrf.mxu0 }
 0x32c   : > { %v5759_v39 = vadd.f32 %v2955_v37, %v5687_v38  ;;  %4816 = vmatmul.mubr.msk.bf16.vlgmr.msra.gmra.mxu0 %vm220_vm2, %v5417_v26  ;;  %v3379_v38 = vsel %vm224_vm1, %v2832_v63, 0  ;;  %v3551_v47 = vsel %vm224_vm1, %v2836_v13, 0 }
 0x32d   : > { %4826 = vmatpush3.bf16.msra.mxu0 %v3293_v34  ;;  %v4776_v51 = vpop.f32.mrf.mxu0  ;;  %4827 = vmatprep.mubr.msk.bf16.mxu0 %vm4946_vm0, %v4945_v0  ;;  %v1238_v34 = vadd.f32 %v5518_v24, %v5476_v33  ;;  %v1254_v33 = vadd.f32 %v5528_v46, %v5494_v58  ;;  %v1270_v58 = vadd.f32 %v5536_v41, %v5498_v48 }
 0x32e   : > { %v5767_v18 = vadd.f32 %v4776_v51, %v5690_v57  ;;  %4837 = vmatprep.subr.bf16.mxu0 %v4945_v0  ;;  %v3465_v57 = vsel %vm224_vm1, %v2834_v31, 0 }
 0x32f   : > { %v5814_v4 = vpop.f32.mrf.mxu0 }
 0x334   : > { %4828 = vmatmul.mubr.msk.bf16.vlgmr.msra.gmra.mxu0 %vm220_vm2, %v5417_v26 }
 0x335   : > { %4838 = vmatpush3.bf16.msra.mxu0 %v3379_v38  ;;  %4839 = vmatprep.mubr.msk.bf16.mxu0 %vm4946_vm0, %v4945_v0  ;;  %v2168_v38 = vadd.f32 %v5703_v6, %v1238_v34  ;;  %v2172_v6 = vadd.f32 %v5714_v20, %v1254_v33  ;;  %v2176_v20 = vadd.f32 %v5725_v28, %v1270_v58 }
 0x336   : > { %4849 = vmatprep.subr.bf16.mxu0 %v4945_v0 }
 0x33c   : > { %4840 = vmatmul.mubr.msk.bf16.vlgmr.msra.gmra.mxu0 %vm220_vm2, %v5417_v26 }
 0x33d   : > { %4850 = vmatpush3.bf16.msra.mxu0 %v3465_v57  ;;  %4851 = vmatprep.mubr.msk.bf16.mxu0 %vm4946_vm0, %v4945_v0 }
 0x33e   : > { %4861 = vmatprep.subr.bf16.mxu0 %v4945_v0 }
 0x344   : > { %4852 = vmatmul.mubr.msk.bf16.vlgmr.msra.gmra.mxu0 %vm220_vm2, %v5417_v26 }
 0x345   : > { %4862 = vmatpush3.bf16.msra.mxu0 %v3551_v47  ;;  %4863 = vmatprep.mubr.msk.bf16.mxu0 %vm4946_vm0, %v4945_v0 }
 0x346   : > { %4873 = vmatprep.subr.bf16.mxu0 %v4945_v0 }
 0x34c   : > { %4864 = vmatmul.mubr.msk.bf16.vlgmr.msra.gmra.mxu0 %vm220_vm2, %v5417_v26 }
 0x34d   : > { %4874 = vmatpush3.bf16.msra.mxu0 %v3637_v60  ;;  %4875 = vmatprep.mubr.msk.bf16.mxu0 %vm4946_vm0, %v4945_v0  ;;  %v4823_v0 = vpop.f32.mrf.mxu1 }
 0x34e   : > { %4885 = vmatprep.subr.bf16.mxu0 %v4935_v1 }
 0x34f   : > { %v3289_v16 = vpop.f32.mrf.mxu1 }
 0x351   : > { %v4824_v8 = vpop.f32.mrf.mxu1 }
 0x353   : > { %v3372_v5 = vpop.f32.mrf.mxu1 }
 0x354   : > { %4876 = vmatmul.mubr.msk.bf16.vlgmr.msra.gmra.mxu0 %vm220_vm2, %v5417_v26 }
 0x355   : > { %4886 = vmatpush3.bf16.msra.mxu0 %v4935_v1  ;;  %4889 = vmatprep.mubr.msk.bf16.mxu0 %vm986_vm3, %v4235_v12  ;;  %v4835_v3 = vpop.f32.mrf.mxu1 }
 0x356   : > { %4887 = vmatprep.subr.bf16.mxu0 %v4936_v50 }
 0x357   : > { %v3375_v49 = vpop.f32.mrf.mxu1 }
 0x359   : > { %4888 = vmatpush3.bf16.msra.mxu0 %v4936_v50  ;;  %v4836_v29 = vpop.f32.mrf.mxu1 }
 0x35b   : > { %v5806_v52 = vpop.f32.mrf.mxu1 }
 0x35c   : > { %4890 = vmatmul.mubr.msk.bf16.vlgmr.msra.gmra.mxu0 %vm986_vm3, %v4236_v14 }
 0x35d   : > { %v4847_v26 = vpop.f32.mrf.mxu1 }
 0x35f   : > { %v3461_v62 = vpop.f32.mrf.mxu1 }
 0x361   : > { %v4848_v15 = vpop.f32.mrf.mxu1 }
 0x363   : > { %v5808_v59 = vpop.f32.mrf.mxu1 }
 0x365   : > { %v4859_v25 = vpop.f32.mrf.mxu1 }
 0x367   : > { %v3547_v12 = vpop.f32.mrf.mxu1 }
 0x369   : > { %v4860_v35 = vpop.f32.mrf.mxu1 }
 0x36b   : > { %v5810_v55 = vpop.f32.mrf.mxu1 }
 0x36d   : > { %v4871_v14 = vpop.f32.mrf.mxu1 }
 0x36f   : > { %v3633_v44 = vpop.f32.mrf.mxu1 }
 0x371   : > { %v4872_v19 = vpop.f32.mrf.mxu1 }
 0x373   : > { %v5812_v21 = vpop.f32.mrf.mxu1 }
 0x375   : > { %v4883_v22 = vpop.f32.mrf.mxu1 }
 0x377   : > { %v3719_v40 = vpop.f32.mrf.mxu1 }
 0x379   : > { %v4884_v56 = vpop.f32.mrf.mxu1 }
 0x3c4   : > { %v4779_v30 = vpop.f32.mrf.mxu0 }
 0x3c5   : > { %v5817_v32 = vadd.f32 %v4779_v30, %v5695_v53 }
 0x3c6   : > { %v2971_v37 = vpop.f32.mrf.mxu0 }
 0x3c7   : > { %v5822_v51 = vadd.f32 %v2971_v37, %v5698_v54 }
 0x3c8   : > { %v4780_v63 = vpop.f32.mrf.mxu0 }
 0x3c9   : > { %v5826_v31 = vadd.f32 %v4780_v63, %v5701_v43 }
 0x3ca   : > { %v2974_v57 = vpop.f32.mrf.mxu0 }
 0x3cb   : > { %v5828_v13 = vadd.f32 %v2974_v57, %v2168_v38 }
 0x3d4   : > { %v4783_v47 = vpop.f32.mrf.mxu0 }
 0x3d5   : > { %v5831_v53 = vadd.f32 %v4783_v47, %v5706_v10  ;;  %v5872_v47 = vld [vmem:[%s5952_s3] ss:$0 sm:$0xff] }
 0x3d6   : > { %v2987_v45 = vpop.f32.mrf.mxu0 }
 0x3d7   : > { %v5836_v24 = vadd.f32 %v2987_v45, %v5709_v2 }
 0x3d8   : > { %v4784_v54 = vpop.f32.mrf.mxu0 }
 0x3d9   : > { %v5840_v43 = vadd.f32 %v4784_v54, %v5712_v61 }
 0x3da   : > { %v2990_v1 = vpop.f32.mrf.mxu0 }
 0x3db   : > { %v5842_v60 = vadd.f32 %v2990_v1, %v2172_v6 }
 0x3e4   : > { %v4787_v50 = vpop.f32.mrf.mxu0 }
 0x3e5   : > { %v5845_v10 = vadd.f32 %v4787_v50, %v5717_v23 }
 0x3e6   : > { %v3003_v0 = vpop.f32.mrf.mxu0 }
 0x3e7   : > { %v5850_v46 = vadd.f32 %v3003_v0, %v5720_v7 }
 0x3e8   : > { %v4788_v2 = vpop.f32.mrf.mxu0 }
 0x3e9   : > { %v5854_v61 = vadd.f32 %v4788_v2, %v5723_v9 }
 0x3ea   : > { %v3006_v16 = vpop.f32.mrf.mxu0 }
 0x3eb   : > { %v5856_v8 = vadd.f32 %v3006_v16, %v2176_v20 }
 0x3ec   : > { %v3243_v3 = vpop.f32.mrf.mxu0 }
 0x3ed   : > { %v4237_v49 = vpack.c.bf16 %v3286_v17, %v3243_v3 }
 0x3ee   : > { %v4817_v23 = vpop.f32.mrf.mxu0 }
 0x3ef   : > { %4893 = vmatprep.mubr.msk.bf16.mxu0 %vm986_vm3, %v4237_v49 }
 0x3f0   : > { %v3246_v29 = vpop.f32.mrf.mxu0 }
 0x3f2   : > { %v4818_v26 = vpop.f32.mrf.mxu0 }
 0x3f4   : > { %v3329_v48 = vpop.f32.mrf.mxu0 }
 0x3f5   : > { %v4238_v41 = vpack.c.bf16 %v3372_v5, %v3329_v48 }
 0x3f6   : > { %v4829_v7 = vpop.f32.mrf.mxu0 }
 0x3f7   : > { %4894 = vmatmul.mubr.msk.bf16.gmra.mxu0 %vm986_vm3, %v4238_v41 }
 0x3f8   : > { %v3332_v62 = vpop.f32.mrf.mxu0 }
 0x3fa   : > { %v4830_v28 = vpop.f32.mrf.mxu0 }
 0x3fc   : > { %v3415_v15 = vpop.f32.mrf.mxu0 }
 0x3fd   : > { %v4239_v9 = vpack.c.bf16 %v5806_v52, %v3415_v15 }
 0x3fe   : > { %v4841_v25 = vpop.f32.mrf.mxu0 }
 0x3ff   : > { %4897 = vmatprep.mubr.msk.bf16.mxu0 %vm986_vm3, %v4239_v9 }
 0x400   : > { %v3418_v12 = vpop.f32.mrf.mxu0 }
 0x402   : > { %v4842_v17 = vpop.f32.mrf.mxu0 }
 0x404   : > { %v3501_v35 = vpop.f32.mrf.mxu0 }
 0x405   : > { %v4240_v14 = vpack.c.bf16 %v5808_v59, %v3501_v35 }
 0x406   : > { %v4853_v44 = vpop.f32.mrf.mxu0 }
 0x407   : > { %4898 = vmatmul.mubr.msk.bf16.gmra.mxu0 %vm986_vm3, %v4240_v14 }
 0x408   : > { %v3504_v5 = vpop.f32.mrf.mxu0 }
 0x40a   : > { %v4854_v19 = vpop.f32.mrf.mxu0 }
 0x40c   : > { %v3587_v22 = vpop.f32.mrf.mxu0 }
 0x40d   : > { %v4241_v40 = vpack.c.bf16 %v5810_v55, %v3587_v22  ;;  %v1222_v55 = vadd.f32 %v5508_v11, %v5468_v27 }
 0x40e   : > { %v4865_v56 = vpop.f32.mrf.mxu0 }
 0x40f   : > { %4901 = vmatprep.mubr.msk.bf16.mxu0 %vm986_vm3, %v4241_v40  ;;  %v2164_v33 = vadd.f32 %v5692_v42, %v1222_v55 }
 0x410   : > { %v3590_v52 = vpop.f32.mrf.mxu0 }
 0x411   : > { %v3019_v27 = vadd.f32 %v5814_v4, %v2164_v33 }
 0x412   : > { %v4866_v30 = vpop.f32.mrf.mxu0 }
 0x414   : > { %v3673_v37 = vpop.f32.mrf.mxu0 }
 0x415   : > { %v4242_v34 = vpack.c.bf16 %v5812_v21, %v3673_v37 }
 0x416   : > { %v4877_v63 = vpop.f32.mrf.mxu0 }
 0x417   : > { %4902 = vmatmul.mubr.msk.bf16.gmra.mxu0 %vm986_vm3, %v4242_v34 }
 0x418   : > { %v3676_v59 = vpop.f32.mrf.mxu0 }
 0x41a   : > { %v4878_v38 = vpop.f32.mrf.mxu0 }
 0x41c   : > { %v4891_v57 = vpop.f32.mrf.mxu0 }
 0x41d   : > { %v3918_v45 = vadd.f32 %v4891_v57, %v5756_v36 }
 0x41e   : > { %v3853_v21 = vpop.f32.mrf.mxu0 }
 0x41f   : > { %v3941_v54 = vadd.f32 %v5872_v47, %v3918_v45  ;;  %v3916_v6 = vadd.f32 %v3853_v21, %v5759_v39 }
 0x420   : > { %v4892_v1 = vpop.f32.mrf.mxu0 }
 0x421   : > { %3957 = vst.msk [vmem:[%s5880_s26 + $0x10] sm:$0xff] %vm986_vm3, %v3941_v54  ;;  %v3939_v11 = vadd.f32 %v5872_v47, %v3916_v6  ;;  %v3919_v36 = vadd.f32 %v4892_v1, %v5767_v18 }
 0x422   : > { %v3856_v50 = vpop.f32.mrf.mxu0 }
 0x423   : > { %3955 = vst.msk [vmem:[%s5880_s26] sm:$0xff] %vm986_vm3, %v3939_v11  ;;  %v3942_v42 = vadd.f32 %v5872_v47, %v3919_v36  ;;  %v3917_v0 = vadd.f32 %v3856_v50, %v3019_v27 }
 0x425   : > { %3958 = vst.msk [vmem:[%s5880_s26 + $0x18] sm:$0xff] %vm986_vm3, %v3942_v42  ;;  %v3940_v39 = vadd.f32 %v5872_v47, %v3917_v0 }
 0x427   : > { %3956 = vst.msk [vmem:[%s5880_s26 + $0x8] sm:$0xff] %vm986_vm3, %v3940_v39 }
 0x4b7   : > { %v4895_v4 = vpop.f32.mrf.mxu0 }
 0x4b8   : > { %v3922_v58 = vadd.f32 %v4895_v4, %v5817_v32 }
 0x4b9   : > { %v3869_v2 = vpop.f32.mrf.mxu0 }
 0x4ba   : > { %v3945_v18 = vadd.f32 %v5872_v47, %v3922_v58  ;;  %v3920_v20 = vadd.f32 %v3869_v2, %v5822_v51 }
 0x4bb   : > { %v4896_v16 = vpop.f32.mrf.mxu0 }
 0x4bc   : > { %3961 = vst.msk [vmem:[%s5880_s26 + $0x30] sm:$0xff] %vm986_vm3, %v3945_v18  ;;  %v3943_v3 = vadd.f32 %v5872_v47, %v3920_v20  ;;  %v3923_v49 = vadd.f32 %v4896_v16, %v5826_v31 }
 0x4bd   : > { %v3872_v23 = vpop.f32.mrf.mxu0 }
 0x4be   : > { %3959 = vst.msk [vmem:[%s5880_s26 + $0x20] sm:$0xff] %vm986_vm3, %v3943_v3  ;;  %v3946_v29 = vadd.f32 %v5872_v47, %v3923_v49  ;;  %v3921_v32 = vadd.f32 %v3872_v23, %v5828_v13 }
 0x4c0   : > { %3962 = vst.msk [vmem:[%s5880_s26 + $0x38] sm:$0xff] %vm986_vm3, %v3946_v29  ;;  %v3944_v51 = vadd.f32 %v5872_v47, %v3921_v32 }
 0x4c2   : > { %3960 = vst.msk [vmem:[%s5880_s26 + $0x28] sm:$0xff] %vm986_vm3, %v3944_v51 }
 0x4c7   : > { %v4899_v26 = vpop.f32.mrf.mxu0 }
 0x4c8   : > { %v3926_v48 = vadd.f32 %v4899_v26, %v5831_v53 }
 0x4c9   : > { %v3885_v31 = vpop.f32.mrf.mxu0 }
 0x4ca   : > { %v3949_v41 = vadd.f32 %v5872_v47, %v3926_v48  ;;  %v3924_v7 = vadd.f32 %v3885_v31, %v5836_v24 }
 0x4cb   : > { %v4900_v62 = vpop.f32.mrf.mxu0 }
 0x4cc   : > { %3965 = vst.msk [vmem:[%s5880_s26 + $0x50] sm:$0xff] %vm986_vm3, %v3949_v41  ;;  %v3947_v13 = vadd.f32 %v5872_v47, %v3924_v7  ;;  %v3927_v28 = vadd.f32 %v4900_v62, %v5840_v43 }
 0x4cd   : > { %v3888_v15 = vpop.f32.mrf.mxu0 }
 0x4ce   : > { %3963 = vst.msk [vmem:[%s5880_s26 + $0x40] sm:$0xff] %vm986_vm3, %v3947_v13  ;;  %v3950_v9 = vadd.f32 %v5872_v47, %v3927_v28  ;;  %v3925_v53 = vadd.f32 %v3888_v15, %v5842_v60 }
 0x4d0   : > { %3966 = vst.msk [vmem:[%s5880_s26 + $0x58] sm:$0xff] %vm986_vm3, %v3950_v9  ;;  %v3948_v24 = vadd.f32 %v5872_v47, %v3925_v53 }
 0x4d2   : > { %3964 = vst.msk [vmem:[%s5880_s26 + $0x48] sm:$0xff] %vm986_vm3, %v3948_v24 }
 0x4d7   : > { %v4903_v25 = vpop.f32.mrf.mxu0 }
 0x4d8   : > { %v3930_v12 = vadd.f32 %v4903_v25, %v5845_v10 }
 0x4d9   : > { %v3901_v43 = vpop.f32.mrf.mxu0 }
 0x4da   : > { %v3953_v17 = vadd.f32 %v5872_v47, %v3930_v12  ;;  %v3928_v35 = vadd.f32 %v3901_v43, %v5850_v46 }
 0x4db   : > { %v4904_v14 = vpop.f32.mrf.mxu0 }
 0x4dc   : > { %3969 = vst.msk [vmem:[%s5880_s26 + $0x70] sm:$0xff] %vm986_vm3, %v3953_v17  ;;  %v3951_v60 = vadd.f32 %v5872_v47, %v3928_v35  ;;  %v3931_v44 = vadd.f32 %v4904_v14, %v5854_v61 }
 0x4dd   : > { %v3904_v5 = vpop.f32.mrf.mxu0 }
 0x4de   : > { %3967 = vst.msk [vmem:[%s5880_s26 + $0x60] sm:$0xff] %vm986_vm3, %v3951_v60  ;;  %v3954_v19 = vadd.f32 %v5872_v47, %v3931_v44  ;;  %v3929_v22 = vadd.f32 %v3904_v5, %v5856_v8 }
 0x4e0   : > { %3970 = vst.msk [vmem:[%s5880_s26 + $0x78] sm:$0xff] %vm986_vm3, %v3954_v19  ;;  %v3952_v10 = vadd.f32 %v5872_v47, %v3929_v22 }
 0x4e2   : > { %3968 = vst.msk [vmem:[%s5880_s26 + $0x68] sm:$0xff] %vm986_vm3, %v3952_v10 }
 0x4e3 PF: > { %s14_s15 = sadd.s32 1, %s4943_s15  }
 0x4e4   : > { %p11_p4 = scmp.ge.s32.totalorder %s14_s15, 4  }
 0x4e6   :  { %13 = sbr.rel (!%p11_p4) target bundleno = 1 (0x1), region = 71 }

</bundles_post_ra>
